<compile_context>
chip_gen: v7x
topology: tpu7x:2x2x1
jax: 0.10.0
libtpu: 0.0.40
codegen_flags: <defaults>
</compile_context>

<pallas_src>
import jax
import jax.numpy as jnp
from jax.experimental import pallas as pl
from jax.experimental.pallas import tpu as pltpu

# ----------------------------- model config ---------------------------------
BATCH = 8
INPUT_SIZE = 64
HIDDEN_SIZE = 32
LATENT_SIZE = 16
NUM_HIDDEN_LAYERS = 3           # matches the PyTorch default

# ----------------------------- packed lane layout ----------------------------
PAD = 128                       # common lane width (one full vreg lane dim)
NLAYERS = 11                    # 4 encoder + 1 fused head + 6 decoder matmuls
MU_OFF = 64                     # mu lives on lanes [64, 80)
LV_OFF = 80                     # logvar (and eps*std) on lanes [80, 96)


def _round_up(n, m):
    return ((n + m - 1) // m) * m


# ------------------------------ Pallas kernel --------------------------------
def make_vae_kernel(bm, n_chunks=2):
    """Build the fused VAE kernel for a [bm, *] batch tile.

    The tile is split into `n_chunks` independent row sub-chains that are
    statically interleaved per layer so the MXU drain of one chain overlaps the
    push of the other (review item 4).
    """
    assert bm % n_chunks == 0
    hs = bm // n_chunks
    assert hs % 8 == 0

    def vae_kernel(x_ref, eps_ref, w_ref, b_ref, out_ref):
        # x_ref  : [bm, 64]          raw inputs (no host-side packing)
        # eps_ref: [bm, 16]          reparameterization noise
        # w_ref  : [11, 128, 128]    resident packed weight slab
        # b_ref  : [11, 1, 128]      resident packed bias slab
        # out_ref: [bm, 128]         recon 0:64 | mu 64:80 | logvar 80:96

        # Hoisted constants (JAX does not CSE broadcasts - build once).
        lane = jax.lax.broadcasted_iota(jnp.int32, (hs, PAD), 1)
        in_band = (lane >= LV_OFF) & (lane < LV_OFF + LATENT_SIZE)
        # Selector matrix: sel[k, j] = 1 iff j == LV_OFF + k.  One tiny K=16
        # matmul places eps onto lanes [80,96) - no cross-lane shuffle, no
        # host-side slab packing (review item 3).
        sel = (jax.lax.broadcasted_iota(jnp.int32, (LATENT_SIZE, PAD), 1)
               == jax.lax.broadcasted_iota(jnp.int32, (LATENT_SIZE, PAD), 0)
               + LV_OFF).astype(jnp.float32)

        chunks = [slice(c * hs, (c + 1) * hs) for c in range(n_chunks)]

        def dot32(a, b):
            return jnp.dot(a, b, preferred_element_type=jnp.float32)

        # ---- encoder layer 0: x [hs,64] @ W0 rows 0:64 -----------------------
        w0 = w_ref[0][:INPUT_SIZE, :]
        b0 = b_ref[0]
        h = [jnp.maximum(dot32(x_ref[rows, :], w0) + b0, 0.0) for rows in chunks]

        # ---- encoder layers 1..3 (chunks interleaved per layer) --------------
        for i in range(1, 4):
            wi, bi = w_ref[i], b_ref[i]
            h = [jnp.maximum(dot32(hc, wi) + bi, 0.0) for hc in h]

        # ---- fused mu/logvar head + shuffle-free reparameterization ----------
        w4, b4 = w_ref[4], b_ref[4]
        z = []
        for c, rows in enumerate(chunks):
            y = dot32(h[c], w4) + b4            # mu @ 64:80, logvar @ 80:96
            out_ref[rows, :] = y                # park y in the output block
            eps_wide = dot32(eps_ref[rows, :], sel)     # eps onto lanes 80:96
            noise = eps_wide * jnp.exp(0.5 * y)         # eps*std (exact 0 off-band)
            # z: mu on 64:80, eps*std on 80:96, exact zeros elsewhere; the first
            # decoder weight has duplicated rows for both bands, so the MXU sums
            # mu + eps*std implicitly.
            z.append(jnp.where(in_band, noise, y))

        # ---- decoder: 5 x (Linear + ReLU), then Linear + Tanh ----------------
        d = z
        for i in range(5, 10):
            wi, bi = w_ref[i], b_ref[i]
            d = [jnp.maximum(dot32(dc, wi) + bi, 0.0) for dc in d]
        w10, b10 = w_ref[10], b_ref[10]
        for c, rows in enumerate(chunks):
            recon = jnp.tanh(dot32(d[c], w10) + b10)    # lanes 0:64; exact 0 else
            out_ref[rows, :] = out_ref[rows, :] + recon # recon | mu | logvar

    return vae_kernel


# ------------------------------ wrapper --------------------------------------
def vae_forward(x, eps, w_slab, b_slab, *, block_batch=256):
    """x: [B, INPUT_SIZE], eps: [B, LATENT_SIZE]. Returns (recon, mu, logvar)."""
    B = x.shape[0]

    # Batch tile: big enough to amortize per-grid-step overhead (review item 1),
    # multiple of 16 (two 8-row-aligned sub-chains), and always >= 2 tiles so
    # both v7x TensorCores get work (review item 2).
    bm = min(_round_up(block_batch, 16), _round_up(max(-(-B // 2), 1), 16))
    Bp = _round_up(B, bm)
    if Bp // bm < 2:
        Bp = 2 * bm
    grid = (Bp // bm,)

    if Bp != B:                       # row padding only when B % bm != 0
        x = jnp.pad(x, ((0, Bp - B), (0, 0)))
        eps = jnp.pad(eps, ((0, Bp - B), (0, 0)))

    out = pl.pallas_call(
        make_vae_kernel(bm, n_chunks=2),
        out_shape=jax.ShapeDtypeStruct((Bp, PAD), jnp.float32),
        grid_spec=pltpu.PrefetchScalarGridSpec(
            num_scalar_prefetch=0,
            grid=grid,
            in_specs=[
                pl.BlockSpec((bm, INPUT_SIZE), lambda i: (i, 0)),      # x
                pl.BlockSpec((bm, LATENT_SIZE), lambda i: (i, 0)),     # eps
                pl.BlockSpec((NLAYERS, PAD, PAD), lambda i: (0, 0, 0)),  # weights (resident)
                pl.BlockSpec((NLAYERS, 1, PAD), lambda i: (0, 0, 0)),    # biases (resident)
            ],
            out_specs=pl.BlockSpec((bm, PAD), lambda i: (i, 0)),
        ),
        compiler_params=pltpu.CompilerParams(
            dimension_semantics=("parallel",),   # shard batch tiles over 2 TCs on v7x
        ),
    )(x, eps, w_slab, b_slab)

    recon = out[:B, :INPUT_SIZE]
    mu = out[:B, MU_OFF:MU_OFF + LATENT_SIZE]
    logvar = out[:B, LV_OFF:LV_OFF + LATENT_SIZE]
    return recon, mu, logvar


# ------------------------- parameter init & packing --------------------------
def init_params(key):
    """Natural per-layer params, 12 x (W[in,out], b[out]), PyTorch layer order."""
    dims = (
        [(INPUT_SIZE, HIDDEN_SIZE)]
        + [(HIDDEN_SIZE, HIDDEN_SIZE)] * NUM_HIDDEN_LAYERS        # encoder
        + [(HIDDEN_SIZE, LATENT_SIZE)] * 2                         # mu, logvar
        + [(LATENT_SIZE, HIDDEN_SIZE), (HIDDEN_SIZE, HIDDEN_SIZE)]
        + [(HIDDEN_SIZE, HIDDEN_SIZE)] * NUM_HIDDEN_LAYERS         # decoder
        + [(HIDDEN_SIZE, INPUT_SIZE)]
    )
    params = []
    for din, dout in dims:
        key, kw, kb = jax.random.split(key, 3)
        s = 1.0 / jnp.sqrt(jnp.float32(din))
        w = jax.random.uniform(kw, (din, dout), jnp.float32, -s, s)
        b = jax.random.uniform(kb, (dout,), jnp.float32, -s, s)
        params.append((w, b))
    return params


def pack_params(params):
    """Pack 12 natural layers into the [11,128,128] / [11,1,128] kernel slabs."""
    enc = params[0:4]
    mu_p, lv_p = params[4], params[5]
    dec = params[6:12]

    w_slab = jnp.zeros((NLAYERS, PAD, PAD), jnp.float32)
    b_slab = jnp.zeros((NLAYERS, 1, PAD), jnp.float32)

    def put(ws, bs, idx, w, b, row_off, col_off):
        din, dout = w.shape
        ws = ws.at[idx, row_off:row_off + din, col_off:col_off + dout].set(w)
        bs = bs.at[idx, 0, col_off:col_off + dout].set(b)
        return ws, bs

    # encoder layers 0..3: rows 0:din, cols 0:HIDDEN
    for i, (w, b) in enumerate(enc):
        w_slab, b_slab = put(w_slab, b_slab, i, w, b, 0, 0)

    # fused head (slab 4): mu -> cols 64:80, logvar -> cols 80:96
    w_slab, b_slab = put(w_slab, b_slab, 4, mu_p[0], mu_p[1], 0, MU_OFF)
    w_slab, b_slab = put(w_slab, b_slab, 4, lv_p[0], lv_p[1], 0, LV_OFF)

    # decoder layer 0 (slab 5): rows 64:80 (mu band) AND duplicated rows 80:96
    # (eps*std band) -> the matmul sums mu + eps*std implicitly.
    w0, b0 = dec[0]
    w_slab, b_slab = put(w_slab, b_slab, 5, w0, b0, MU_OFF, 0)
    w_slab = w_slab.at[5, LV_OFF:LV_OFF + LATENT_SIZE, 0:HIDDEN_SIZE].set(w0)

    # remaining decoder layers (slabs 6..10)
    for j, (w, b) in enumerate(dec[1:], start=6):
        w_slab, b_slab = put(w_slab, b_slab, j, w, b, 0, 0)

    return w_slab, b_slab


# ------------------------------ pure-JAX reference ---------------------------
def vae_ref(x, eps, params):
    enc = params[0:4]
    mu_p, lv_p = params[4], params[5]
    dec = params[6:12]

    h = x
    for w, b in enc:
        h = jnp.maximum(h @ w + b, 0.0)
    mu = h @ mu_p[0] + mu_p[1]
    logvar = h @ lv_p[0] + lv_p[1]
    # TODO(synk): torch.randn_like inside reparameterize is nondeterministic;
    # the noise `eps` is generated in JAX and passed in explicitly instead.
    z = mu + eps * jnp.exp(0.5 * logvar)
    d = z
    for w, b in dec[:-1]:
        d = jnp.maximum(d @ w + b, 0.0)
    recon = jnp.tanh(d @ dec[-1][0] + dec[-1][1])
    return recon, mu, logvar


# ----------------------------------- main ------------------------------------
if __name__ == "__main__":
    key = jax.random.PRNGKey(0)
    k_param, k_x, k_eps = jax.random.split(key, 3)

    params = init_params(k_param)
    w_slab, b_slab = pack_params(params)

    x = jax.random.normal(k_x, (BATCH, INPUT_SIZE), jnp.float32)
    eps = jax.random.normal(k_eps, (BATCH, LATENT_SIZE), jnp.float32)

    fwd = jax.jit(lambda x_, e_: vae_forward(x_, e_, w_slab, b_slab))
    recon, mu, logvar = fwd(x, eps)
    jax.block_until_ready((recon, mu, logvar))

    # correctness check against the unpadded pure-JAX reference
    r_ref, mu_ref, lv_ref = vae_ref(x, eps, params)
    assert jnp.allclose(recon, r_ref, atol=1e-4, rtol=1e-4)
    assert jnp.allclose(mu, mu_ref, atol=1e-4, rtol=1e-4)
    assert jnp.allclose(logvar, lv_ref, atol=1e-4, rtol=1e-4)

    print("KERNEL_OK")
</pallas_src>

<mosaic_0001>
module attributes {stable_mosaic.version = 11 : i64} {
  func.func @vae_kernel(%arg0: i32, %arg1: memref<16x64xf32, #tpu.memory_space<vmem>>, %arg2: memref<16x16xf32, #tpu.memory_space<vmem>>, %arg3: memref<11x128x128xf32, #tpu.memory_space<vmem>>, %arg4: memref<11x1x128xf32, #tpu.memory_space<vmem>>, %arg5: memref<16x128xf32, #tpu.memory_space<vmem>>) attributes {dimension_semantics = [#tpu.dimension_semantics<parallel>], iteration_bounds = array<i64: 2>, scalar_prefetch = 0 : i64, scratch_operands = 0 : i64, tpu.core_type = #tpu.core_type<tc>, window_params = [{transform_indices = @transform_0, window_bounds = array<i64: 16, 64>}, {transform_indices = @transform_1, window_bounds = array<i64: 16, 16>}, {pipeline_mode = #tpu.pipeline_mode<synchronous>, transform_indices = @transform_2, window_bounds = array<i64: 11, 128, 128>}, {pipeline_mode = #tpu.pipeline_mode<synchronous>, transform_indices = @transform_3, window_bounds = array<i64: 11, 1, 128>}, {transform_indices = @transform_4, window_bounds = array<i64: 16, 128>}]} {
    %0 = tpu.iota {dimensions = array<i32: 1>} : vector<8x128xi32>
    %c80_i32 = arith.constant 80 : i32
    %1 = vector.broadcast %c80_i32 : i32 to vector<8x128xi32>
    %2 = arith.cmpi sge, %0, %1 : vector<8x128xi32>
    %c96_i32 = arith.constant 96 : i32
    %3 = vector.broadcast %c96_i32 : i32 to vector<8x128xi32>
    %4 = arith.cmpi slt, %0, %3 : vector<8x128xi32>
    %5 = arith.andi %2, %4 : vector<8x128xi1>
    %6 = tpu.iota {dimensions = array<i32: 1>} : vector<16x128xi32>
    %7 = tpu.iota {dimensions = array<i32: 0>} : vector<16x128xi32>
    %c80_i32_0 = arith.constant 80 : i32
    %8 = vector.broadcast %c80_i32_0 : i32 to vector<16x128xi32>
    %9 = arith.addi %7, %8 : vector<16x128xi32>
    %10 = arith.cmpi eq, %6, %9 : vector<16x128xi32>
    %11 = arith.extui %10 : vector<16x128xi1> to vector<16x128xi32>
    %12 = arith.sitofp %11 : vector<16x128xi32> to vector<16x128xf32>
    %c0 = arith.constant 0 : index
    %c0_1 = arith.constant 0 : index
    %c0_2 = arith.constant 0 : index
    %13 = vector.load %arg3[%c0, %c0_1, %c0_2] : memref<11x128x128xf32, #tpu.memory_space<vmem>>, vector<1x128x128xf32>
    %14 = vector.shape_cast %13 : vector<1x128x128xf32> to vector<128x128xf32>
    %15 = vector.extract_strided_slice %14 {offsets = [0, 0], sizes = [64, 128], strides = [1, 1]} : vector<128x128xf32> to vector<64x128xf32>
    %c0_3 = arith.constant 0 : index
    %c0_4 = arith.constant 0 : index
    %c0_5 = arith.constant 0 : index
    %16 = vector.load %arg4[%c0_3, %c0_4, %c0_5] : memref<11x1x128xf32, #tpu.memory_space<vmem>>, vector<1x1x128xf32>
    %17 = vector.shape_cast %16 : vector<1x1x128xf32> to vector<1x128xf32>
    %c0_6 = arith.constant 0 : index
    %c0_7 = arith.constant 0 : index
    %18 = vector.load %arg1[%c0_6, %c0_7] : memref<16x64xf32, #tpu.memory_space<vmem>>, vector<8x64xf32>
    %cst = arith.constant dense<0.000000e+00> : vector<8x128xf32>
    %19 = tpu.matmul %18, %15, %cst {dimension_numbers = #tpu.dot_dimension_numbers<[1], [0], [0], [1], [0, 0, 1, 1], [], []>} : vector<8x64xf32>, vector<64x128xf32>, vector<8x128xf32> -> vector<8x128xf32>
    %20 = vector.broadcast %17 : vector<1x128xf32> to vector<8x128xf32>
    %21 = arith.addf %19, %20 : vector<8x128xf32>
    %cst_8 = arith.constant 0.000000e+00 : f32
    %22 = vector.broadcast %cst_8 : f32 to vector<8x128xf32>
    %23 = arith.maximumf %21, %22 : vector<8x128xf32>
    %c8 = arith.constant 8 : index
    %c0_9 = arith.constant 0 : index
    %24 = vector.load %arg1[%c8, %c0_9] : memref<16x64xf32, #tpu.memory_space<vmem>>, vector<8x64xf32>
    %cst_10 = arith.constant dense<0.000000e+00> : vector<8x128xf32>
    %25 = tpu.matmul %24, %15, %cst_10 {dimension_numbers = #tpu.dot_dimension_numbers<[1], [0], [0], [1], [0, 0, 1, 1], [], []>} : vector<8x64xf32>, vector<64x128xf32>, vector<8x128xf32> -> vector<8x128xf32>
    %26 = vector.broadcast %17 : vector<1x128xf32> to vector<8x128xf32>
    %27 = arith.addf %25, %26 : vector<8x128xf32>
    %cst_11 = arith.constant 0.000000e+00 : f32
    %28 = vector.broadcast %cst_11 : f32 to vector<8x128xf32>
    %29 = arith.maximumf %27, %28 : vector<8x128xf32>
    %c1 = arith.constant 1 : index
    %c0_12 = arith.constant 0 : index
    %c0_13 = arith.constant 0 : index
    %30 = vector.load %arg3[%c1, %c0_12, %c0_13] : memref<11x128x128xf32, #tpu.memory_space<vmem>>, vector<1x128x128xf32>
    %31 = vector.shape_cast %30 : vector<1x128x128xf32> to vector<128x128xf32>
    %c1_14 = arith.constant 1 : index
    %c0_15 = arith.constant 0 : index
    %c0_16 = arith.constant 0 : index
    %32 = vector.load %arg4[%c1_14, %c0_15, %c0_16] : memref<11x1x128xf32, #tpu.memory_space<vmem>>, vector<1x1x128xf32>
    %33 = vector.shape_cast %32 : vector<1x1x128xf32> to vector<1x128xf32>
    %cst_17 = arith.constant dense<0.000000e+00> : vector<8x128xf32>
    %34 = tpu.matmul %23, %31, %cst_17 {dimension_numbers = #tpu.dot_dimension_numbers<[1], [0], [0], [1], [0, 0, 1, 1], [], []>} : vector<8x128xf32>, vector<128x128xf32>, vector<8x128xf32> -> vector<8x128xf32>
    %35 = vector.broadcast %33 : vector<1x128xf32> to vector<8x128xf32>
    %36 = arith.addf %34, %35 : vector<8x128xf32>
    %cst_18 = arith.constant 0.000000e+00 : f32
    %37 = vector.broadcast %cst_18 : f32 to vector<8x128xf32>
    %38 = arith.maximumf %36, %37 : vector<8x128xf32>
    %cst_19 = arith.constant dense<0.000000e+00> : vector<8x128xf32>
    %39 = tpu.matmul %29, %31, %cst_19 {dimension_numbers = #tpu.dot_dimension_numbers<[1], [0], [0], [1], [0, 0, 1, 1], [], []>} : vector<8x128xf32>, vector<128x128xf32>, vector<8x128xf32> -> vector<8x128xf32>
    %40 = vector.broadcast %33 : vector<1x128xf32> to vector<8x128xf32>
    %41 = arith.addf %39, %40 : vector<8x128xf32>
    %cst_20 = arith.constant 0.000000e+00 : f32
    %42 = vector.broadcast %cst_20 : f32 to vector<8x128xf32>
    %43 = arith.maximumf %41, %42 : vector<8x128xf32>
    %c2 = arith.constant 2 : index
    %c0_21 = arith.constant 0 : index
    %c0_22 = arith.constant 0 : index
    %44 = vector.load %arg3[%c2, %c0_21, %c0_22] : memref<11x128x128xf32, #tpu.memory_space<vmem>>, vector<1x128x128xf32>
    %45 = vector.shape_cast %44 : vector<1x128x128xf32> to vector<128x128xf32>
    %c2_23 = arith.constant 2 : index
    %c0_24 = arith.constant 0 : index
    %c0_25 = arith.constant 0 : index
    %46 = vector.load %arg4[%c2_23, %c0_24, %c0_25] : memref<11x1x128xf32, #tpu.memory_space<vmem>>, vector<1x1x128xf32>
    %47 = vector.shape_cast %46 : vector<1x1x128xf32> to vector<1x128xf32>
    %cst_26 = arith.constant dense<0.000000e+00> : vector<8x128xf32>
    %48 = tpu.matmul %38, %45, %cst_26 {dimension_numbers = #tpu.dot_dimension_numbers<[1], [0], [0], [1], [0, 0, 1, 1], [], []>} : vector<8x128xf32>, vector<128x128xf32>, vector<8x128xf32> -> vector<8x128xf32>
    %49 = vector.broadcast %47 : vector<1x128xf32> to vector<8x128xf32>
    %50 = arith.addf %48, %49 : vector<8x128xf32>
    %cst_27 = arith.constant 0.000000e+00 : f32
    %51 = vector.broadcast %cst_27 : f32 to vector<8x128xf32>
    %52 = arith.maximumf %50, %51 : vector<8x128xf32>
    %cst_28 = arith.constant dense<0.000000e+00> : vector<8x128xf32>
    %53 = tpu.matmul %43, %45, %cst_28 {dimension_numbers = #tpu.dot_dimension_numbers<[1], [0], [0], [1], [0, 0, 1, 1], [], []>} : vector<8x128xf32>, vector<128x128xf32>, vector<8x128xf32> -> vector<8x128xf32>
    %54 = vector.broadcast %47 : vector<1x128xf32> to vector<8x128xf32>
    %55 = arith.addf %53, %54 : vector<8x128xf32>
    %cst_29 = arith.constant 0.000000e+00 : f32
    %56 = vector.broadcast %cst_29 : f32 to vector<8x128xf32>
    %57 = arith.maximumf %55, %56 : vector<8x128xf32>
    %c3 = arith.constant 3 : index
    %c0_30 = arith.constant 0 : index
    %c0_31 = arith.constant 0 : index
    %58 = vector.load %arg3[%c3, %c0_30, %c0_31] : memref<11x128x128xf32, #tpu.memory_space<vmem>>, vector<1x128x128xf32>
    %59 = vector.shape_cast %58 : vector<1x128x128xf32> to vector<128x128xf32>
    %c3_32 = arith.constant 3 : index
    %c0_33 = arith.constant 0 : index
    %c0_34 = arith.constant 0 : index
    %60 = vector.load %arg4[%c3_32, %c0_33, %c0_34] : memref<11x1x128xf32, #tpu.memory_space<vmem>>, vector<1x1x128xf32>
    %61 = vector.shape_cast %60 : vector<1x1x128xf32> to vector<1x128xf32>
    %cst_35 = arith.constant dense<0.000000e+00> : vector<8x128xf32>
    %62 = tpu.matmul %52, %59, %cst_35 {dimension_numbers = #tpu.dot_dimension_numbers<[1], [0], [0], [1], [0, 0, 1, 1], [], []>} : vector<8x128xf32>, vector<128x128xf32>, vector<8x128xf32> -> vector<8x128xf32>
    %63 = vector.broadcast %61 : vector<1x128xf32> to vector<8x128xf32>
    %64 = arith.addf %62, %63 : vector<8x128xf32>
    %cst_36 = arith.constant 0.000000e+00 : f32
    %65 = vector.broadcast %cst_36 : f32 to vector<8x128xf32>
    %66 = arith.maximumf %64, %65 : vector<8x128xf32>
    %cst_37 = arith.constant dense<0.000000e+00> : vector<8x128xf32>
    %67 = tpu.matmul %57, %59, %cst_37 {dimension_numbers = #tpu.dot_dimension_numbers<[1], [0], [0], [1], [0, 0, 1, 1], [], []>} : vector<8x128xf32>, vector<128x128xf32>, vector<8x128xf32> -> vector<8x128xf32>
    %68 = vector.broadcast %61 : vector<1x128xf32> to vector<8x128xf32>
    %69 = arith.addf %67, %68 : vector<8x128xf32>
    %cst_38 = arith.constant 0.000000e+00 : f32
    %70 = vector.broadcast %cst_38 : f32 to vector<8x128xf32>
    %71 = arith.maximumf %69, %70 : vector<8x128xf32>
    %c4 = arith.constant 4 : index
    %c0_39 = arith.constant 0 : index
    %c0_40 = arith.constant 0 : index
    %72 = vector.load %arg3[%c4, %c0_39, %c0_40] : memref<11x128x128xf32, #tpu.memory_space<vmem>>, vector<1x128x128xf32>
    %73 = vector.shape_cast %72 : vector<1x128x128xf32> to vector<128x128xf32>
    %c4_41 = arith.constant 4 : index
    %c0_42 = arith.constant 0 : index
    %c0_43 = arith.constant 0 : index
    %74 = vector.load %arg4[%c4_41, %c0_42, %c0_43] : memref<11x1x128xf32, #tpu.memory_space<vmem>>, vector<1x1x128xf32>
    %75 = vector.shape_cast %74 : vector<1x1x128xf32> to vector<1x128xf32>
    %cst_44 = arith.constant dense<0.000000e+00> : vector<8x128xf32>
    %76 = tpu.matmul %66, %73, %cst_44 {dimension_numbers = #tpu.dot_dimension_numbers<[1], [0], [0], [1], [0, 0, 1, 1], [], []>} : vector<8x128xf32>, vector<128x128xf32>, vector<8x128xf32> -> vector<8x128xf32>
    %77 = vector.broadcast %75 : vector<1x128xf32> to vector<8x128xf32>
    %78 = arith.addf %76, %77 : vector<8x128xf32>
    %c0_45 = arith.constant 0 : index
    %c0_46 = arith.constant 0 : index
    %79 = vector.load %arg5[%c0_45, %c0_46] : memref<16x128xf32, #tpu.memory_space<vmem>>, vector<8x128xf32>
    tpu.vector_store %arg5[%c0_45, %c0_46], %78 {strides = array<i32>} : memref<16x128xf32, #tpu.memory_space<vmem>>, vector<8x128xf32>,
    %c0_47 = arith.constant 0 : index
    %c0_48 = arith.constant 0 : index
    %80 = vector.load %arg2[%c0_47, %c0_48] : memref<16x16xf32, #tpu.memory_space<vmem>>, vector<8x16xf32>
    %cst_49 = arith.constant dense<0.000000e+00> : vector<8x128xf32>
    %81 = tpu.matmul %80, %12, %cst_49 {dimension_numbers = #tpu.dot_dimension_numbers<[1], [0], [0], [1], [0, 0, 1, 1], [], []>} : vector<8x16xf32>, vector<16x128xf32>, vector<8x128xf32> -> vector<8x128xf32>
    %cst_50 = arith.constant 5.000000e-01 : f32
    %82 = vector.broadcast %cst_50 : f32 to vector<8x128xf32>
    %83 = arith.mulf %82, %78 : vector<8x128xf32>
    %84 = math.exp %83 : vector<8x128xf32>
    %85 = arith.mulf %81, %84 : vector<8x128xf32>
    %86 = arith.select %5, %85, %78 : vector<8x128xi1>, vector<8x128xf32>
    %cst_51 = arith.constant dense<0.000000e+00> : vector<8x128xf32>
    %87 = tpu.matmul %71, %73, %cst_51 {dimension_numbers = #tpu.dot_dimension_numbers<[1], [0], [0], [1], [0, 0, 1, 1], [], []>} : vector<8x128xf32>, vector<128x128xf32>, vector<8x128xf32> -> vector<8x128xf32>
    %88 = vector.broadcast %75 : vector<1x128xf32> to vector<8x128xf32>
    %89 = arith.addf %87, %88 : vector<8x128xf32>
    %c8_52 = arith.constant 8 : index
    %c0_53 = arith.constant 0 : index
    %90 = vector.load %arg5[%c8_52, %c0_53] : memref<16x128xf32, #tpu.memory_space<vmem>>, vector<8x128xf32>
    tpu.vector_store %arg5[%c8_52, %c0_53], %89 {strides = array<i32>} : memref<16x128xf32, #tpu.memory_space<vmem>>, vector<8x128xf32>,
    %c8_54 = arith.constant 8 : index
    %c0_55 = arith.constant 0 : index
    %91 = vector.load %arg2[%c8_54, %c0_55] : memref<16x16xf32, #tpu.memory_space<vmem>>, vector<8x16xf32>
    %cst_56 = arith.constant dense<0.000000e+00> : vector<8x128xf32>
    %92 = tpu.matmul %91, %12, %cst_56 {dimension_numbers = #tpu.dot_dimension_numbers<[1], [0], [0], [1], [0, 0, 1, 1], [], []>} : vector<8x16xf32>, vector<16x128xf32>, vector<8x128xf32> -> vector<8x128xf32>
    %cst_57 = arith.constant 5.000000e-01 : f32
    %93 = vector.broadcast %cst_57 : f32 to vector<8x128xf32>
    %94 = arith.mulf %93, %89 : vector<8x128xf32>
    %95 = math.exp %94 : vector<8x128xf32>
    %96 = arith.mulf %92, %95 : vector<8x128xf32>
    %97 = arith.select %5, %96, %89 : vector<8x128xi1>, vector<8x128xf32>
    %c5 = arith.constant 5 : index
    %c0_58 = arith.constant 0 : index
    %c0_59 = arith.constant 0 : index
    %98 = vector.load %arg3[%c5, %c0_58, %c0_59] : memref<11x128x128xf32, #tpu.memory_space<vmem>>, vector<1x128x128xf32>
    %99 = vector.shape_cast %98 : vector<1x128x128xf32> to vector<128x128xf32>
    %c5_60 = arith.constant 5 : index
    %c0_61 = arith.constant 0 : index
    %c0_62 = arith.constant 0 : index
    %100 = vector.load %arg4[%c5_60, %c0_61, %c0_62] : memref<11x1x128xf32, #tpu.memory_space<vmem>>, vector<1x1x128xf32>
    %101 = vector.shape_cast %100 : vector<1x1x128xf32> to vector<1x128xf32>
    %cst_63 = arith.constant dense<0.000000e+00> : vector<8x128xf32>
    %102 = tpu.matmul %86, %99, %cst_63 {dimension_numbers = #tpu.dot_dimension_numbers<[1], [0], [0], [1], [0, 0, 1, 1], [], []>} : vector<8x128xf32>, vector<128x128xf32>, vector<8x128xf32> -> vector<8x128xf32>
    %103 = vector.broadcast %101 : vector<1x128xf32> to vector<8x128xf32>
    %104 = arith.addf %102, %103 : vector<8x128xf32>
    %cst_64 = arith.constant 0.000000e+00 : f32
    %105 = vector.broadcast %cst_64 : f32 to vector<8x128xf32>
    %106 = arith.maximumf %104, %105 : vector<8x128xf32>
    %cst_65 = arith.constant dense<0.000000e+00> : vector<8x128xf32>
    %107 = tpu.matmul %97, %99, %cst_65 {dimension_numbers = #tpu.dot_dimension_numbers<[1], [0], [0], [1], [0, 0, 1, 1], [], []>} : vector<8x128xf32>, vector<128x128xf32>, vector<8x128xf32> -> vector<8x128xf32>
    %108 = vector.broadcast %101 : vector<1x128xf32> to vector<8x128xf32>
    %109 = arith.addf %107, %108 : vector<8x128xf32>
    %cst_66 = arith.constant 0.000000e+00 : f32
    %110 = vector.broadcast %cst_66 : f32 to vector<8x128xf32>
    %111 = arith.maximumf %109, %110 : vector<8x128xf32>
    %c6 = arith.constant 6 : index
    %c0_67 = arith.constant 0 : index
    %c0_68 = arith.constant 0 : index
    %112 = vector.load %arg3[%c6, %c0_67, %c0_68] : memref<11x128x128xf32, #tpu.memory_space<vmem>>, vector<1x128x128xf32>
    %113 = vector.shape_cast %112 : vector<1x128x128xf32> to vector<128x128xf32>
    %c6_69 = arith.constant 6 : index
    %c0_70 = arith.constant 0 : index
    %c0_71 = arith.constant 0 : index
    %114 = vector.load %arg4[%c6_69, %c0_70, %c0_71] : memref<11x1x128xf32, #tpu.memory_space<vmem>>, vector<1x1x128xf32>
    %115 = vector.shape_cast %114 : vector<1x1x128xf32> to vector<1x128xf32>
    %cst_72 = arith.constant dense<0.000000e+00> : vector<8x128xf32>
    %116 = tpu.matmul %106, %113, %cst_72 {dimension_numbers = #tpu.dot_dimension_numbers<[1], [0], [0], [1], [0, 0, 1, 1], [], []>} : vector<8x128xf32>, vector<128x128xf32>, vector<8x128xf32> -> vector<8x128xf32>
    %117 = vector.broadcast %115 : vector<1x128xf32> to vector<8x128xf32>
    %118 = arith.addf %116, %117 : vector<8x128xf32>
    %cst_73 = arith.constant 0.000000e+00 : f32
    %119 = vector.broadcast %cst_73 : f32 to vector<8x128xf32>
    %120 = arith.maximumf %118, %119 : vector<8x128xf32>
    %cst_74 = arith.constant dense<0.000000e+00> : vector<8x128xf32>
    %121 = tpu.matmul %111, %113, %cst_74 {dimension_numbers = #tpu.dot_dimension_numbers<[1], [0], [0], [1], [0, 0, 1, 1], [], []>} : vector<8x128xf32>, vector<128x128xf32>, vector<8x128xf32> -> vector<8x128xf32>
    %122 = vector.broadcast %115 : vector<1x128xf32> to vector<8x128xf32>
    %123 = arith.addf %121, %122 : vector<8x128xf32>
    %cst_75 = arith.constant 0.000000e+00 : f32
    %124 = vector.broadcast %cst_75 : f32 to vector<8x128xf32>
    %125 = arith.maximumf %123, %124 : vector<8x128xf32>
    %c7 = arith.constant 7 : index
    %c0_76 = arith.constant 0 : index
    %c0_77 = arith.constant 0 : index
    %126 = vector.load %arg3[%c7, %c0_76, %c0_77] : memref<11x128x128xf32, #tpu.memory_space<vmem>>, vector<1x128x128xf32>
    %127 = vector.shape_cast %126 : vector<1x128x128xf32> to vector<128x128xf32>
    %c7_78 = arith.constant 7 : index
    %c0_79 = arith.constant 0 : index
    %c0_80 = arith.constant 0 : index
    %128 = vector.load %arg4[%c7_78, %c0_79, %c0_80] : memref<11x1x128xf32, #tpu.memory_space<vmem>>, vector<1x1x128xf32>
    %129 = vector.shape_cast %128 : vector<1x1x128xf32> to vector<1x128xf32>
    %cst_81 = arith.constant dense<0.000000e+00> : vector<8x128xf32>
    %130 = tpu.matmul %120, %127, %cst_81 {dimension_numbers = #tpu.dot_dimension_numbers<[1], [0], [0], [1], [0, 0, 1, 1], [], []>} : vector<8x128xf32>, vector<128x128xf32>, vector<8x128xf32> -> vector<8x128xf32>
    %131 = vector.broadcast %129 : vector<1x128xf32> to vector<8x128xf32>
    %132 = arith.addf %130, %131 : vector<8x128xf32>
    %cst_82 = arith.constant 0.000000e+00 : f32
    %133 = vector.broadcast %cst_82 : f32 to vector<8x128xf32>
    %134 = arith.maximumf %132, %133 : vector<8x128xf32>
    %cst_83 = arith.constant dense<0.000000e+00> : vector<8x128xf32>
    %135 = tpu.matmul %125, %127, %cst_83 {dimension_numbers = #tpu.dot_dimension_numbers<[1], [0], [0], [1], [0, 0, 1, 1], [], []>} : vector<8x128xf32>, vector<128x128xf32>, vector<8x128xf32> -> vector<8x128xf32>
    %136 = vector.broadcast %129 : vector<1x128xf32> to vector<8x128xf32>
    %137 = arith.addf %135, %136 : vector<8x128xf32>
    %cst_84 = arith.constant 0.000000e+00 : f32
    %138 = vector.broadcast %cst_84 : f32 to vector<8x128xf32>
    %139 = arith.maximumf %137, %138 : vector<8x128xf32>
    %c8_85 = arith.constant 8 : index
    %c0_86 = arith.constant 0 : index
    %c0_87 = arith.constant 0 : index
    %140 = vector.load %arg3[%c8_85, %c0_86, %c0_87] : memref<11x128x128xf32, #tpu.memory_space<vmem>>, vector<1x128x128xf32>
    %141 = vector.shape_cast %140 : vector<1x128x128xf32> to vector<128x128xf32>
    %c8_88 = arith.constant 8 : index
    %c0_89 = arith.constant 0 : index
    %c0_90 = arith.constant 0 : index
    %142 = vector.load %arg4[%c8_88, %c0_89, %c0_90] : memref<11x1x128xf32, #tpu.memory_space<vmem>>, vector<1x1x128xf32>
    %143 = vector.shape_cast %142 : vector<1x1x128xf32> to vector<1x128xf32>
    %cst_91 = arith.constant dense<0.000000e+00> : vector<8x128xf32>
    %144 = tpu.matmul %134, %141, %cst_91 {dimension_numbers = #tpu.dot_dimension_numbers<[1], [0], [0], [1], [0, 0, 1, 1], [], []>} : vector<8x128xf32>, vector<128x128xf32>, vector<8x128xf32> -> vector<8x128xf32>
    %145 = vector.broadcast %143 : vector<1x128xf32> to vector<8x128xf32>
    %146 = arith.addf %144, %145 : vector<8x128xf32>
    %cst_92 = arith.constant 0.000000e+00 : f32
    %147 = vector.broadcast %cst_92 : f32 to vector<8x128xf32>
    %148 = arith.maximumf %146, %147 : vector<8x128xf32>
    %cst_93 = arith.constant dense<0.000000e+00> : vector<8x128xf32>
    %149 = tpu.matmul %139, %141, %cst_93 {dimension_numbers = #tpu.dot_dimension_numbers<[1], [0], [0], [1], [0, 0, 1, 1], [], []>} : vector<8x128xf32>, vector<128x128xf32>, vector<8x128xf32> -> vector<8x128xf32>
    %150 = vector.broadcast %143 : vector<1x128xf32> to vector<8x128xf32>
    %151 = arith.addf %149, %150 : vector<8x128xf32>
    %cst_94 = arith.constant 0.000000e+00 : f32
    %152 = vector.broadcast %cst_94 : f32 to vector<8x128xf32>
    %153 = arith.maximumf %151, %152 : vector<8x128xf32>
    %c9 = arith.constant 9 : index
    %c0_95 = arith.constant 0 : index
    %c0_96 = arith.constant 0 : index
    %154 = vector.load %arg3[%c9, %c0_95, %c0_96] : memref<11x128x128xf32, #tpu.memory_space<vmem>>, vector<1x128x128xf32>
    %155 = vector.shape_cast %154 : vector<1x128x128xf32> to vector<128x128xf32>
    %c9_97 = arith.constant 9 : index
    %c0_98 = arith.constant 0 : index
    %c0_99 = arith.constant 0 : index
    %156 = vector.load %arg4[%c9_97, %c0_98, %c0_99] : memref<11x1x128xf32, #tpu.memory_space<vmem>>, vector<1x1x128xf32>
    %157 = vector.shape_cast %156 : vector<1x1x128xf32> to vector<1x128xf32>
    %cst_100 = arith.constant dense<0.000000e+00> : vector<8x128xf32>
    %158 = tpu.matmul %148, %155, %cst_100 {dimension_numbers = #tpu.dot_dimension_numbers<[1], [0], [0], [1], [0, 0, 1, 1], [], []>} : vector<8x128xf32>, vector<128x128xf32>, vector<8x128xf32> -> vector<8x128xf32>
    %159 = vector.broadcast %157 : vector<1x128xf32> to vector<8x128xf32>
    %160 = arith.addf %158, %159 : vector<8x128xf32>
    %cst_101 = arith.constant 0.000000e+00 : f32
    %161 = vector.broadcast %cst_101 : f32 to vector<8x128xf32>
    %162 = arith.maximumf %160, %161 : vector<8x128xf32>
    %cst_102 = arith.constant dense<0.000000e+00> : vector<8x128xf32>
    %163 = tpu.matmul %153, %155, %cst_102 {dimension_numbers = #tpu.dot_dimension_numbers<[1], [0], [0], [1], [0, 0, 1, 1], [], []>} : vector<8x128xf32>, vector<128x128xf32>, vector<8x128xf32> -> vector<8x128xf32>
    %164 = vector.broadcast %157 : vector<1x128xf32> to vector<8x128xf32>
    %165 = arith.addf %163, %164 : vector<8x128xf32>
    %cst_103 = arith.constant 0.000000e+00 : f32
    %166 = vector.broadcast %cst_103 : f32 to vector<8x128xf32>
    %167 = arith.maximumf %165, %166 : vector<8x128xf32>
    %c10 = arith.constant 10 : index
    %c0_104 = arith.constant 0 : index
    %c0_105 = arith.constant 0 : index
    %168 = vector.load %arg3[%c10, %c0_104, %c0_105] : memref<11x128x128xf32, #tpu.memory_space<vmem>>, vector<1x128x128xf32>
    %169 = vector.shape_cast %168 : vector<1x128x128xf32> to vector<128x128xf32>
    %c10_106 = arith.constant 10 : index
    %c0_107 = arith.constant 0 : index
    %c0_108 = arith.constant 0 : index
    %170 = vector.load %arg4[%c10_106, %c0_107, %c0_108] : memref<11x1x128xf32, #tpu.memory_space<vmem>>, vector<1x1x128xf32>
    %171 = vector.shape_cast %170 : vector<1x1x128xf32> to vector<1x128xf32>
    %cst_109 = arith.constant dense<0.000000e+00> : vector<8x128xf32>
    %172 = tpu.matmul %162, %169, %cst_109 {dimension_numbers = #tpu.dot_dimension_numbers<[1], [0], [0], [1], [0, 0, 1, 1], [], []>} : vector<8x128xf32>, vector<128x128xf32>, vector<8x128xf32> -> vector<8x128xf32>
    %173 = vector.broadcast %171 : vector<1x128xf32> to vector<8x128xf32>
    %174 = arith.addf %172, %173 : vector<8x128xf32>
    %175 = math.tanh %174 : vector<8x128xf32>
    %c0_110 = arith.constant 0 : index
    %c0_111 = arith.constant 0 : index
    %176 = vector.load %arg5[%c0_110, %c0_111] : memref<16x128xf32, #tpu.memory_space<vmem>>, vector<8x128xf32>
    %177 = arith.addf %176, %175 : vector<8x128xf32>
    %c0_112 = arith.constant 0 : index
    %c0_113 = arith.constant 0 : index
    %178 = vector.load %arg5[%c0_112, %c0_113] : memref<16x128xf32, #tpu.memory_space<vmem>>, vector<8x128xf32>
    tpu.vector_store %arg5[%c0_112, %c0_113], %177 {strides = array<i32>} : memref<16x128xf32, #tpu.memory_space<vmem>>, vector<8x128xf32>,
    %cst_114 = arith.constant dense<0.000000e+00> : vector<8x128xf32>
    %179 = tpu.matmul %167, %169, %cst_114 {dimension_numbers = #tpu.dot_dimension_numbers<[1], [0], [0], [1], [0, 0, 1, 1], [], []>} : vector<8x128xf32>, vector<128x128xf32>, vector<8x128xf32> -> vector<8x128xf32>
    %180 = vector.broadcast %171 : vector<1x128xf32> to vector<8x128xf32>
    %181 = arith.addf %179, %180 : vector<8x128xf32>
    %182 = math.tanh %181 : vector<8x128xf32>
    %c8_115 = arith.constant 8 : index
    %c0_116 = arith.constant 0 : index
    %183 = vector.load %arg5[%c8_115, %c0_116] : memref<16x128xf32, #tpu.memory_space<vmem>>, vector<8x128xf32>
    %184 = arith.addf %183, %182 : vector<8x128xf32>
    %c8_117 = arith.constant 8 : index
    %c0_118 = arith.constant 0 : index
    %185 = vector.load %arg5[%c8_117, %c0_118] : memref<16x128xf32, #tpu.memory_space<vmem>>, vector<8x128xf32>
    tpu.vector_store %arg5[%c8_117, %c0_118], %184 {strides = array<i32>} : memref<16x128xf32, #tpu.memory_space<vmem>>, vector<8x128xf32>,
    return
  }
  func.func @transform_0(%arg0: i32) -> (i32, i32) {
    %c0_i32 = arith.constant 0 : i32
    %c0_i32_0 = arith.constant 0 : i32
    return %arg0, %c0_i32 : i32, i32
  }
  func.func @transform_1(%arg0: i32) -> (i32, i32) {
    %c0_i32 = arith.constant 0 : i32
    %c0_i32_0 = arith.constant 0 : i32
    return %arg0, %c0_i32 : i32, i32
  }
  func.func @transform_2(%arg0: i32) -> (i32, i32, i32) {
    %c0_i32 = arith.constant 0 : i32
    %c0_i32_0 = arith.constant 0 : i32
    %c0_i32_1 = arith.constant 0 : i32
    %c0_i32_2 = arith.constant 0 : i32
    return %c0_i32, %c0_i32_0, %c0_i32_1 : i32, i32, i32
  }
  func.func @transform_3(%arg0: i32) -> (i32, i32, i32) {
    %c0_i32 = arith.constant 0 : i32
    %c0_i32_0 = arith.constant 0 : i32
    %c0_i32_1 = arith.constant 0 : i32
    %c0_i32_2 = arith.constant 0 : i32
    return %c0_i32, %c0_i32_0, %c0_i32_1 : i32, i32, i32
  }
  func.func @transform_4(%arg0: i32) -> (i32, i32) {
    %c0_i32 = arith.constant 0 : i32
    %c0_i32_0 = arith.constant 0 : i32
    return %arg0, %c0_i32 : i32, i32
  }
}

</mosaic_0001>

<bundles_post_ra>
// kernel: _lambda_.1
= control target key start
LH: loop header
LB: loop body
LE: loop exit
PB: predicated region body
PF: predicated region fallthrough
CT: control target
= control target key end

     0   :  { %9 = vsyncpa [#allocation3], 0  ;;  %s4112_s15 = smov 0   ;;  %s4463_s0 = inlined_call_operand.vmem [shape: f32[32,64], index: 0, kind: input, shape index: {}]   ;;  %s4464_s1 = inlined_call_operand.vmem [shape: f32[32,16], index: 1, kind: input, shape index: {}]   ;;  %s4465_s2 = inlined_call_operand.hbm [shape: f32[11,128,128], index: 2, kind: input, shape index: {}]   ;;  %s4466_s3 = inlined_call_operand.vmem [shape: f32[11,1,128], index: 3, kind: input, shape index: {}]   ;;  %s4467_s4 = inlined_call_operand.vmem [shape: f32[32,128], index: 4, kind: output, shape index: {}]  }
   0x1 LB: > { %s2335_s16 = sadd.s32 4294967295, %s4078_s15   ;;  %p2337_p0 = scmp.ge.s32.totalorder %s4078_s15, 1  ;;  %s4078_s15 = sphi %s4112_s15, %s15_s15  }
   0x2   : > { %p140_p1 = scmp.lt.s32.totalorder %s4078_s15, 3  ;;  %s4080_s17 = smov [#allocation2]  }
   0x3   : > { %s152_s18 = sshll.u32 %s4080_s17, 4  ;;  %p4126_p3 = scmp.eq.s32.totalorder %s2335_s16, 0  ;;  %s153_s18 = int_to_ptr.vmem [resolvable:$true] %s152_s18 }
   0x4   : > { %p4120_p2 = pnand %p2337_p0, %p140_p1  ;;  %s4040_s24 = scalar_lea.hbm %s4465_s2, 22528 }
   0x5   : > { %s4472_s20 = scalar_select %p4126_p3, 1, 0 }
   0x6   : > { %s4471_s19 = scalar_select %p4120_p2, 1, 0 }
   0x7   : > { %p4011_p4 = pneg %p4120_p2  ;;  %p4041_p6 = scmp.ne.s32.totalorder %s4465_s2, %s4040_s24 }
   0x8   : > { %p4047_p10 = scmp.lt.u32.totalorder %s4040_s24, %s4465_s2 }
   0x9   : > { %p4134_p5 = pnand %p4126_p3, %p4011_p4 }
   0xb   : > { %p4042_p7 = pneg %p4134_p5 }
   0xd   : > { %p4043_p8 = pnand %p4042_p7, %p4041_p6 }
   0xf   : > { %p4044_p9 = pneg %p4043_p8 }
  0x11   : > { %p4049_p11 = pnand %p4047_p10, %p4044_p9 }
  0x13   : > { %4052 = shalt.err (!%p4049_p11)
}
  0x14   : > { %s4053_s29 = scalar_lea.vmem %s153_s18, 22528  ;;  %p4061_p1 = scmp.lt.s32.totalorder %s153_s18, %s153_s18 }
  0x15   : > { %p4054_p12 = scmp.ne.s32.totalorder %s153_s18, %s4053_s29  ;;  %p4062_p4 = scmp.lt.s32.totalorder %s4053_s29, %s4053_s29 }
  0x17   : > { %p4056_p13 = pnand %p4054_p12, %p4042_p7  ;;  %p4063_p3 = por %p4062_p4, %p4061_p1 }
  0x19   : > { %p4057_p0 = pneg %p4056_p13 }
  0x1b   : > { %p4064_p2 = pnand %p4063_p3, %p4057_p0 }
  0x1d   : > { %4067 = shalt.err (!%p4064_p2)
}
  0x1e   : > { %s4081_s30 = smov 128   ;;  %s4082_s5 = smov 8  }
  0x1f   : > { %4014 = dma.hbm_to_vmem [thread:$0]  (!%p4134_p5), %s4465_s2, 22528, %s153_s18, [#allocation3], %s4081_s30, %s4081_s30, %s4082_s5  }
  0x20   : > { %p4474_p6 = scmp.ne.s32.totalorder %s4471_s19, 0 }
  0x21   : > { %p4475_p8 = scmp.ne.s32.totalorder (!%p4474_p6), %s4472_s20, 0 }
  0x22   : > { %189 = sbr.rel (%p4474_p6) target bundleno = 2466 (0x9a2), region = 36 }
  0x29   : > { %4073 = dma.done.wait (%p4475_p8), [#allocation3], 22528  }
  0x2a   : > { %4075 = vsyncadd (%p4475_p8), [#allocation3], 4294944768  ;;  %v4083_v0 = vmov 0.0|0.0   ;;  %vm4084_vm0 = vmmov 0   ;;  %v4085_v1 = vmov 0.0   ;;  %s2342_s8 = sshll.u32 %s2335_s16, 1 }
  0x2b   : > { %3497 = vmatprep.subr.bf16.mxu0 %v4083_v0  ;;  %3509 = vmatprep.subr.bf16.mxu1 %v4083_v0  ;;  %v254_v2 = vld [vmem:[#allocation2] sm:$0xff]  ;;  %v255_v3 = vld [vmem:[#allocation2 + $0x8] sm:$0xff]  ;;  %v256_v4 = vld [vmem:[#allocation2 + $0x10] sm:$0xff]  ;;  %p221_p2 = scmp.lt.s32.totalorder %s2342_s8, 3  ;;  %vm270_vm1 = vcmask 523264   ;;  %vm1018_vm5 = vcmask 130048  }
  0x2c   : > { %2761 = vmatprep.mubr.msk.f32.mxu0 %vm4084_vm0, %v4085_v1  ;;  %2780 = vmatprep.mubr.msk.f32.mxu1 %vm4084_vm0, %v4085_v1  ;;  %v3498_v5 = vpack.c.bf16 %v255_v3, %v254_v2  ;;  %v257_v6 = vld [vmem:[#allocation2 + $0x18] sm:$0xff]  ;;  %v258_v8 = vld [vmem:[#allocation2 + $0x20] sm:$0xff]  ;;  %v259_v9 = vld [vmem:[#allocation2 + $0x28] sm:$0xff] }
  0x2d   : > { %v3501_v7 = vpack.c.bf16 %v257_v6, %v256_v4  ;;  %s4479_s8 = smov (!%p221_p2, %s2342_s8), 3  ;;  %v3504_v10 = vpack.c.bf16 %v259_v9, %v258_v8  ;;  %v260_v11 = vld [vmem:[#allocation2 + $0x30] sm:$0xff]  ;;  %v261_v12 = vld [vmem:[#allocation2 + $0x38] sm:$0xff]  ;;  %v421_v14 = vld [vmem:[#allocation2 + $0x80] sm:$0xff] }
  0x2e   : > { %3499 = vmatpush3.bf16.msra.mxu0 %v3498_v5  ;;  %3511 = vmatpush3.bf16.msra.mxu1 %v3498_v5  ;;  %s4172_s9 = sshll.u32 %s4479_s8, 3  ;;  %v3507_v13 = vpack.c.bf16 %v261_v12, %v260_v11  ;;  %v422_v15 = vld [vmem:[#allocation2 + $0x88] sm:$0xff]  ;;  %v423_v19 = vld [vmem:[#allocation2 + $0x90] sm:$0xff]  ;;  %v424_v20 = vld [vmem:[#allocation2 + $0x98] sm:$0xff] }
  0x2f   : > { %3500 = vmatprep.subr.bf16.mxu0 %v4083_v0  ;;  %3512 = vmatprep.subr.bf16.mxu1 %v4083_v0  ;;  %s224_s12 = scalar_lea.vmem %s4463_s0, %s4172_s9  ;;  %v3522_v18 = vpack.c.bf16 %v422_v15, %v421_v14  ;;  %v3525_v21 = vpack.c.bf16 %v424_v20, %v423_v19  ;;  %v425_v22 = vld [vmem:[#allocation2 + $0xa0] sm:$0xff]  ;;  %v426_v23 = vld [vmem:[#allocation2 + $0xa8] sm:$0xff]  ;;  %v427_v25 = vld [vmem:[#allocation2 + $0xb0] sm:$0xff]  ;;  %s4263_s22 = scalar_lea.vmem %s4464_s1, %s4172_s9 }
  0x30   : > { %v263_v16 = vld [vmem:[%s224_s12] sm:$0xff]  ;;  %v345_v17 = vld [vmem:[%s224_s12 + $0x8] sm:$0xff]  ;;  %v3528_v24 = vpack.c.bf16 %v426_v23, %v425_v22  ;;  %v428_v26 = vld [vmem:[#allocation2 + $0xb8] sm:$0xff]  ;;  %s4333_s29 = scalar_lea.vmem %s4467_s4, %s4172_s9 }
  0x31   : > { %v3531_v27 = vpack.c.bf16 %v428_v26, %v427_v25  ;;  %v429_v28 = vld [vmem:[#allocation2 + $0xc0] sm:$0xff]  ;;  %v430_v29 = vld [vmem:[#allocation2 + $0xc8] sm:$0xff]  ;;  %v431_v31 = vld [vmem:[#allocation2 + $0xd0] sm:$0xff] }
  0x32   : > { %3502 = vmatpush3.bf16.msra.mxu0 %v3501_v7  ;;  %3514 = vmatpush3.bf16.msra.mxu1 %v3501_v7  ;;  %v3534_v30 = vpack.c.bf16 %v430_v29, %v429_v28  ;;  %v432_v32 = vld [vmem:[#allocation2 + $0xd8] sm:$0xff]  ;;  %v433_v34 = vld [vmem:[#allocation2 + $0xe0] sm:$0xff]  ;;  %v434_v35 = vld [vmem:[#allocation2 + $0xe8] sm:$0xff] }
  0x33   : > { %3503 = vmatprep.subr.bf16.mxu0 %v4083_v0  ;;  %3515 = vmatprep.subr.bf16.mxu1 %v4083_v0  ;;  %v3537_v33 = vpack.c.bf16 %v432_v32, %v431_v31  ;;  %v3540_v36 = vpack.c.bf16 %v434_v35, %v433_v34  ;;  %v435_v37 = vld [vmem:[#allocation2 + $0xf0] sm:$0xff]  ;;  %v436_v38 = vld [vmem:[#allocation2 + $0xf8] sm:$0xff]  ;;  %v2350_v40 = vld [vmem:[%s4466_s3] ss:$0 sm:$0xff] }
  0x34   : > { %v3543_v39 = vpack.c.bf16 %v436_v38, %v435_v37  ;;  %v588_v41 = vld [vmem:[#allocation2 + $0x100] sm:$0xff]  ;;  %v589_v42 = vld [vmem:[#allocation2 + $0x108] sm:$0xff]  ;;  %v590_v52 = vld [vmem:[#allocation2 + $0x110] sm:$0xff] }
  0x35   : > { %v3570_v49 = vpack.c.bf16 %v589_v42, %v588_v41  ;;  %v591_v53 = vld [vmem:[#allocation2 + $0x118] sm:$0xff]  ;;  %v592_v55 = vld [vmem:[#allocation2 + $0x120] sm:$0xff]  ;;  %v593_v56 = vld [vmem:[#allocation2 + $0x128] sm:$0xff] }
  0x36   : > { %3505 = vmatpush3.bf16.msra.mxu0 %v3504_v10  ;;  %3517 = vmatpush3.bf16.msra.mxu1 %v3504_v10  ;;  %v3573_v54 = vpack.c.bf16 %v591_v53, %v590_v52  ;;  %v3576_v57 = vpack.c.bf16 %v593_v56, %v592_v55  ;;  %v594_v58 = vld [vmem:[#allocation2 + $0x130] sm:$0xff]  ;;  %v595_v59 = vld [vmem:[#allocation2 + $0x138] sm:$0xff]  ;;  %v596_v61 = vld [vmem:[#allocation2 + $0x140] sm:$0xff] }
  0x37   : > { %3506 = vmatprep.subr.bf16.mxu0 %v4083_v0  ;;  %3518 = vmatprep.subr.bf16.mxu1 %v4083_v0  ;;  %v3579_v60 = vpack.c.bf16 %v595_v59, %v594_v58  ;;  %v597_v62 = vld [vmem:[#allocation2 + $0x148] sm:$0xff]  ;;  %v598_v2 = vld [vmem:[#allocation2 + $0x150] sm:$0xff]  ;;  %v599_v3 = vld [vmem:[#allocation2 + $0x158] sm:$0xff] }
  0x38   : > { %v3582_v63 = vpack.c.bf16 %v597_v62, %v596_v61  ;;  %v3585_v4 = vpack.c.bf16 %v599_v3, %v598_v2  ;;  %v600_v5 = vld [vmem:[#allocation2 + $0x160] sm:$0xff]  ;;  %v601_v6 = vld [vmem:[#allocation2 + $0x168] sm:$0xff]  ;;  %v602_v8 = vld [vmem:[#allocation2 + $0x170] sm:$0xff]  ;;  %v4086_v3 = vmov 1.0|1.0  }
  0x39   : > { %v3588_v7 = vpack.c.bf16 %v601_v6, %v600_v5  ;;  %v603_v9 = vld [vmem:[#allocation2 + $0x178] sm:$0xff]  ;;  %v2354_v11 = vld [vmem:[%s4466_s3 + $0x1] ss:$0 sm:$0xff]  ;;  %v757_v23 = vld [vmem:[#allocation2 + $0x190] sm:$0xff] }
  0x3a   : > { %3508 = vmatpush3.bf16.msra.mxu0 %v3507_v13  ;;  %3520 = vmatpush3.bf16.msra.mxu1 %v3507_v13  ;;  %v3591_v10 = vpack.c.bf16 %v603_v9, %v602_v8  ;;  %v755_v12 = vld [vmem:[#allocation2 + $0x180] sm:$0xff]  ;;  %v756_v13 = vld [vmem:[#allocation2 + $0x188] sm:$0xff]  ;;  %v761_v29 = vld [vmem:[#allocation2 + $0x1b0] sm:$0xff] }
  0x3b   : > { %3521 = vmatprep.subr.bf16.mxu0 %v4083_v0  ;;  %3545 = vmatprep.subr.bf16.mxu1 %v4083_v0  ;;  %v3618_v20 = vpack.c.bf16 %v756_v13, %v755_v12  ;;  %v759_v26 = vld [vmem:[#allocation2 + $0x1a0] sm:$0xff]  ;;  %v765_v35 = vld [vmem:[#allocation2 + $0x1d0] sm:$0xff]  ;;  %v770_v42 = vld [vmem:[#allocation2 + $0x1f8] sm:$0xff] }
  0x3c   : > { %v763_v32 = vld [vmem:[#allocation2 + $0x1c0] sm:$0xff]  ;;  %v769_v41 = vld [vmem:[#allocation2 + $0x1f0] sm:$0xff]  ;;  %v925_v2 = vld [vmem:[#allocation2 + $0x218] sm:$0xff] }
  0x3d   : > { %2762 = vmatmul.mubr.msk.f32.vlgmr.msra.gmra.mrb[0].mxu0 %vm270_vm1, %v263_v16  ;;  %2781 = vmatmul.mubr.msk.f32.vlgmr.msra.gmra.mrb[0].mxu1 %vm270_vm1, %v345_v17  ;;  %v767_v38 = vld [vmem:[#allocation2 + $0x1e0] sm:$0xff]  ;;  %v928_v9 = vld [vmem:[#allocation2 + $0x230] sm:$0xff]  ;;  %v931_v13 = vld [vmem:[#allocation2 + $0x248] sm:$0xff] }
  0x3e   : > { %3523 = vmatpush3.bf16.msra.mxu0 %v3522_v18  ;;  %3547 = vmatpush3.bf16.msra.mxu1 %v3522_v18  ;;  %v922_v53 = vld [vmem:[#allocation2 + $0x200] sm:$0xff] }
  0x3f   : > { %3524 = vmatprep.subr.bf16.mxu0 %v4083_v0  ;;  %3548 = vmatprep.subr.bf16.mxu1 %v4083_v0  ;;  %v926_v6 = vld [vmem:[#allocation2 + $0x220] sm:$0xff] }
  0x40   : > { %2815 = vmatprep.mubr.msk.f32.mxu0 %vm4084_vm0, %v4085_v1  ;;  %2850 = vmatprep.mubr.msk.f32.mxu1 %vm4084_vm0, %v4085_v1  ;;  %v930_v12 = vld [vmem:[#allocation2 + $0x240] sm:$0xff] }
  0x41   : > { %v2360_v61 = vld [vmem:[%s4466_s3 + $0x4] ss:$0 sm:$0xff] }
  0x42   : > { %3526 = vmatpush3.bf16.msra.mxu0 %v3525_v21  ;;  %3550 = vmatpush3.bf16.msra.mxu1 %v3525_v21 }
  0x43   : > { %3527 = vmatprep.subr.bf16.mxu0 %v4083_v0  ;;  %3551 = vmatprep.subr.bf16.mxu1 %v4083_v0 }
  0x46   : > { %3529 = vmatpush3.bf16.msra.mxu0 %v3528_v24  ;;  %3553 = vmatpush3.bf16.msra.mxu1 %v3528_v24  ;;  %v758_v24 = vld [vmem:[#allocation2 + $0x198] sm:$0xff] }
  0x47   : > { %3530 = vmatprep.subr.bf16.mxu0 %v4083_v0  ;;  %3554 = vmatprep.subr.bf16.mxu1 %v4083_v0  ;;  %v3621_v25 = vpack.c.bf16 %v758_v24, %v757_v23  ;;  %v2358_v24 = vld [vmem:[%s4466_s3 + $0x3] ss:$0 sm:$0xff] }
  0x4a   : > { %3532 = vmatpush3.bf16.msra.mxu0 %v3531_v27  ;;  %3556 = vmatpush3.bf16.msra.mxu1 %v3531_v27  ;;  %v760_v27 = vld [vmem:[#allocation2 + $0x1a8] sm:$0xff] }
  0x4b   : > { %3533 = vmatprep.subr.bf16.mxu0 %v4083_v0  ;;  %3557 = vmatprep.subr.bf16.mxu1 %v4083_v0  ;;  %v3624_v28 = vpack.c.bf16 %v760_v27, %v759_v26  ;;  %v1248_v27 = vld [vmem:[#allocation2 + $0x280] sm:$0xff] }
  0x4e   : > { %3535 = vmatpush3.bf16.msra.mxu0 %v3534_v30  ;;  %3559 = vmatpush3.bf16.msra.mxu1 %v3534_v30  ;;  %v762_v30 = vld [vmem:[#allocation2 + $0x1b8] sm:$0xff] }
  0x4f   : > { %3536 = vmatprep.subr.bf16.mxu0 %v4083_v0  ;;  %3560 = vmatprep.subr.bf16.mxu1 %v4083_v0  ;;  %v3627_v31 = vpack.c.bf16 %v762_v30, %v761_v29 }
  0x52   : > { %3538 = vmatpush3.bf16.msra.mxu0 %v3537_v33  ;;  %3562 = vmatpush3.bf16.msra.mxu1 %v3537_v33  ;;  %v764_v33 = vld [vmem:[#allocation2 + $0x1c8] sm:$0xff] }
  0x53   : > { %3539 = vmatprep.subr.bf16.mxu0 %v4083_v0  ;;  %3563 = vmatprep.subr.bf16.mxu1 %v4083_v0  ;;  %v3630_v34 = vpack.c.bf16 %v764_v33, %v763_v32 }
  0x56   : > { %3541 = vmatpush3.bf16.msra.mxu0 %v3540_v36  ;;  %3565 = vmatpush3.bf16.msra.mxu1 %v3540_v36  ;;  %v766_v36 = vld [vmem:[#allocation2 + $0x1d8] sm:$0xff] }
  0x57   : > { %3542 = vmatprep.subr.bf16.mxu0 %v4083_v0  ;;  %3566 = vmatprep.subr.bf16.mxu1 %v4083_v0  ;;  %v3633_v37 = vpack.c.bf16 %v766_v36, %v765_v35 }
  0x5a   : > { %3544 = vmatpush3.bf16.msra.mxu0 %v3543_v39  ;;  %3568 = vmatpush3.bf16.msra.mxu1 %v3543_v39  ;;  %v768_v39 = vld [vmem:[#allocation2 + $0x1e8] sm:$0xff] }
  0x5b   : > { %3569 = vmatprep.subr.bf16.mxu0 %v4083_v0  ;;  %3593 = vmatprep.subr.bf16.mxu1 %v4083_v0 }
 0x110   : > { %v340_v43 = vpop.f32.mrb[0].mxu0  ;;  %v415_v44 = vpop.f32.mrb[0].mxu1 }
 0x111   : > { %v341_v45 = vadd.f32 %v2350_v40, %v340_v43  ;;  %v416_v46 = vadd.f32 %v2350_v40, %v415_v44  ;;  %v2763_v47 = vpop.f32.mrb[1].mxu0  ;;  %v2782_v48 = vpop.f32.mrb[1].mxu1  ;;  %v3636_v40 = vpack.c.bf16 %v768_v39, %v767_v38  ;;  %v3639_v43 = vpack.c.bf16 %v770_v42, %v769_v41  ;;  %v1251_v38 = vld [vmem:[#allocation2 + $0x298] sm:$0xff]  ;;  %v1252_v42 = vld [vmem:[#allocation2 + $0x2a0] sm:$0xff] }
 0x112   : > { %v238_v44 = vlaneseq }
 0x113   : > { %v344_v50 = vmax.f32 %v341_v45, 0.0  ;;  %v419_v51 = vmax.f32 %v416_v46, 0.0 }
 0x114   : > { %v244_v45 = vshrl.u32 %v238_v44, 7  ;;  %v4248_v47 = vand.u32 127, %v238_v44 }
 0x115   : > { %2816 = vmatmul.mubr.f32.vlgmr.msra.gmra.mrb[2].mxu0 %v344_v50  ;;  %2851 = vmatmul.mubr.f32.vlgmr.msra.gmra.mrb[2].mxu1 %v419_v51  ;;  %v2356_v50 = vld [vmem:[%s4466_s3 + $0x2] ss:$0 sm:$0xff] }
 0x116   : > { %3571 = vmatpush3.bf16.msra.mxu0 %v3570_v49  ;;  %3595 = vmatpush3.bf16.msra.mxu1 %v3570_v49  ;;  %v245_v46 = vadd.s32 8, %v244_v45  ;;  %v246_v48 = vadd.s32 80, %v244_v45  ;;  %v1254_v45 = vld [vmem:[#allocation2 + $0x2b0] sm:$0xff]  ;;  %vm240_vm6 = vcmp.ge.s32.totalorder %v4248_v47, 80  ;;  %vm241_vm7 = vcmp.lt.s32.totalorder %v4248_v47, 96 }
 0x117   : > { %3572 = vmatprep.subr.bf16.mxu0 %v4083_v0  ;;  %3596 = vmatprep.subr.bf16.mxu1 %v4083_v0  ;;  %vm242_vm8 = vmand %vm240_vm6, %vm241_vm7 }
 0x118   : > { %2885 = vmatprep.mubr.msk.f32.mxu0 %vm4084_vm0, %v4085_v1  ;;  %2920 = vmatprep.mubr.msk.f32.mxu1 %vm4084_vm0, %v4085_v1  ;;  %v247_v49 = vadd.s32 80, %v245_v46  ;;  %vm248_vm2 = vcmp.eq.s32.totalorder %v4248_v47, %v246_v48  ;;  %v1255_v46 = vld [vmem:[#allocation2 + $0x2b8] sm:$0xff] }
 0x119   : > { %v3729_v48 = vpack.c.bf16 %v1255_v46, %v1254_v45 }
 0x11a   : > { %3574 = vmatpush3.bf16.msra.mxu0 %v3573_v54  ;;  %3598 = vmatpush3.bf16.msra.mxu1 %v3573_v54  ;;  %vm249_vm3 = vcmp.eq.s32.totalorder %v4248_v47, %v247_v49  ;;  %v923_v54 = vld [vmem:[#allocation2 + $0x208] sm:$0xff]  ;;  %v1256_v49 = vld [vmem:[#allocation2 + $0x2c0] sm:$0xff] }
 0x11b   : > { %3575 = vmatprep.subr.bf16.mxu0 %v4083_v0  ;;  %3599 = vmatprep.subr.bf16.mxu1 %v4083_v0  ;;  %vm4255_vm4 = vmpackc.low %vm249_vm3, %vm248_vm2  ;;  %v3666_v62 = vpack.c.bf16 %v923_v54, %v922_v53  ;;  %v1259_v53 = vld [vmem:[#allocation2 + $0x2d8] sm:$0xff]  ;;  %v1260_v54 = vld [vmem:[#allocation2 + $0x2e0] sm:$0xff] }
 0x11c   : > { %v1419_v47 = vld [vmem:[#allocation2 + $0x320] sm:$0xff] }
 0x11e   : > { %3577 = vmatpush3.bf16.msra.mxu0 %v3576_v57  ;;  %3601 = vmatpush3.bf16.msra.mxu1 %v3576_v57 }
 0x11f   : > { %3578 = vmatprep.subr.bf16.mxu0 %v4083_v0  ;;  %3602 = vmatprep.subr.bf16.mxu1 %v4083_v0 }
 0x122   : > { %3580 = vmatpush3.bf16.msra.mxu0 %v3579_v60  ;;  %3604 = vmatpush3.bf16.msra.mxu1 %v3579_v60 }
 0x123   : > { %3581 = vmatprep.subr.bf16.mxu0 %v4083_v0  ;;  %3605 = vmatprep.subr.bf16.mxu1 %v4083_v0 }
 0x126   : > { %3583 = vmatpush3.bf16.msra.mxu0 %v3582_v63  ;;  %3607 = vmatpush3.bf16.msra.mxu1 %v3582_v63  ;;  %v924_v63 = vld [vmem:[#allocation2 + $0x210] sm:$0xff] }
 0x127   : > { %3584 = vmatprep.subr.bf16.mxu0 %v4083_v0  ;;  %3608 = vmatprep.subr.bf16.mxu1 %v4083_v0  ;;  %v3669_v5 = vpack.c.bf16 %v925_v2, %v924_v63 }
 0x12a   : > { %3586 = vmatpush3.bf16.msra.mxu0 %v3585_v4  ;;  %3610 = vmatpush3.bf16.msra.mxu1 %v3585_v4  ;;  %v1017_v4 = vld [vmem:[%s4263_s22] sm:$0xff] }
 0x12b   : > { %3587 = vmatprep.subr.bf16.mxu0 %v4083_v0  ;;  %3611 = vmatprep.subr.bf16.mxu1 %v4083_v0 }
 0x12e   : > { %3589 = vmatpush3.bf16.msra.mxu0 %v3588_v7  ;;  %3613 = vmatpush3.bf16.msra.mxu1 %v3588_v7  ;;  %v927_v7 = vld [vmem:[#allocation2 + $0x228] sm:$0xff] }
 0x12f   : > { %3590 = vmatprep.subr.bf16.mxu0 %v4083_v0  ;;  %3614 = vmatprep.subr.bf16.mxu1 %v4083_v0  ;;  %v3672_v8 = vpack.c.bf16 %v927_v7, %v926_v6 }
 0x132   : > { %3592 = vmatpush3.bf16.msra.mxu0 %v3591_v10  ;;  %3616 = vmatpush3.bf16.msra.mxu1 %v3591_v10  ;;  %v929_v10 = vld [vmem:[#allocation2 + $0x238] sm:$0xff] }
 0x133   : > { %3617 = vmatprep.subr.bf16.mxu0 %v4083_v0  ;;  %3641 = vmatprep.subr.bf16.mxu1 %v4083_v0 }
 0x1e8   : > { %v511_v14 = vpop.f32.mrb[2].mxu0  ;;  %v582_v15 = vpop.f32.mrb[2].mxu1 }
 0x1e9   : > { %v512_v16 = vadd.f32 %v2354_v11, %v511_v14  ;;  %v583_v17 = vadd.f32 %v2354_v11, %v582_v15  ;;  %v2817_v18 = vpop.f32.mrb[3].mxu0  ;;  %v2852_v19 = vpop.f32.mrb[3].mxu1  ;;  %v3675_v11 = vpack.c.bf16 %v929_v10, %v928_v9  ;;  %v3678_v14 = vpack.c.bf16 %v931_v13, %v930_v12  ;;  %v932_v15 = vld [vmem:[#allocation2 + $0x250] sm:$0xff]  ;;  %v1415_v12 = vld [vmem:[#allocation2 + $0x300] sm:$0xff]  ;;  %v1416_v13 = vld [vmem:[#allocation2 + $0x308] sm:$0xff] }
 0x1ea   : > { %v934_v18 = vld [vmem:[#allocation2 + $0x260] sm:$0xff]  ;;  %v935_v19 = vld [vmem:[#allocation2 + $0x268] sm:$0xff] }
 0x1eb   : > { %v515_v21 = vmax.f32 %v512_v16, 0.0  ;;  %v586_v22 = vmax.f32 %v583_v17, 0.0  ;;  %v933_v16 = vld [vmem:[#allocation2 + $0x258] sm:$0xff] }
 0x1ec   : > { %v3681_v17 = vpack.c.bf16 %v933_v16, %v932_v15 }
 0x1ed   : > { %2886 = vmatmul.mubr.f32.vlgmr.msra.gmra.mrb[4].mxu0 %v515_v21  ;;  %2921 = vmatmul.mubr.f32.vlgmr.msra.gmra.mrb[4].mxu1 %v586_v22  ;;  %v936_v21 = vld [vmem:[#allocation2 + $0x270] sm:$0xff]  ;;  %v937_v22 = vld [vmem:[#allocation2 + $0x278] sm:$0xff] }
 0x1ee   : > { %3619 = vmatpush3.bf16.msra.mxu0 %v3618_v20  ;;  %3643 = vmatpush3.bf16.msra.mxu1 %v3618_v20  ;;  %v3684_v20 = vpack.c.bf16 %v935_v19, %v934_v18  ;;  %v3687_v23 = vpack.c.bf16 %v937_v22, %v936_v21  ;;  %v1417_v19 = vld [vmem:[#allocation2 + $0x310] sm:$0xff] }
 0x1ef   : > { %3620 = vmatprep.subr.bf16.mxu0 %v4083_v0  ;;  %3644 = vmatprep.subr.bf16.mxu1 %v4083_v0 }
 0x1f0   : > { %2955 = vmatprep.mubr.msk.f32.mxu0 %vm4084_vm0, %v4085_v1  ;;  %2990 = vmatprep.mubr.msk.f32.mxu1 %vm4084_vm0, %v4085_v1 }
 0x1f2   : > { %3622 = vmatpush3.bf16.msra.mxu0 %v3621_v25  ;;  %3646 = vmatpush3.bf16.msra.mxu1 %v3621_v25 }
 0x1f3   : > { %3623 = vmatprep.subr.bf16.mxu0 %v4083_v0  ;;  %3647 = vmatprep.subr.bf16.mxu1 %v4083_v0 }
 0x1f6   : > { %3625 = vmatpush3.bf16.msra.mxu0 %v3624_v28  ;;  %3649 = vmatpush3.bf16.msra.mxu1 %v3624_v28  ;;  %v1249_v28 = vld [vmem:[#allocation2 + $0x288] sm:$0xff] }
 0x1f7   : > { %3626 = vmatprep.subr.bf16.mxu0 %v4083_v0  ;;  %3650 = vmatprep.subr.bf16.mxu1 %v4083_v0  ;;  %v3720_v35 = vpack.c.bf16 %v1249_v28, %v1248_v27  ;;  %v1422_v27 = vld [vmem:[#allocation2 + $0x338] sm:$0xff] }
 0x1fa   : > { %3628 = vmatpush3.bf16.msra.mxu0 %v3627_v31  ;;  %3652 = vmatpush3.bf16.msra.mxu1 %v3627_v31 }
 0x1fb   : > { %3629 = vmatprep.subr.bf16.mxu0 %v4083_v0  ;;  %3653 = vmatprep.subr.bf16.mxu1 %v4083_v0 }
 0x1fe   : > { %3631 = vmatpush3.bf16.msra.mxu0 %v3630_v34  ;;  %3655 = vmatpush3.bf16.msra.mxu1 %v3630_v34 }
 0x1ff   : > { %3632 = vmatprep.subr.bf16.mxu0 %v4083_v0  ;;  %3656 = vmatprep.subr.bf16.mxu1 %v4083_v0 }
 0x202   : > { %3634 = vmatpush3.bf16.msra.mxu0 %v3633_v37  ;;  %3658 = vmatpush3.bf16.msra.mxu1 %v3633_v37  ;;  %v1250_v37 = vld [vmem:[#allocation2 + $0x290] sm:$0xff] }
 0x203   : > { %3635 = vmatprep.subr.bf16.mxu0 %v4083_v0  ;;  %3659 = vmatprep.subr.bf16.mxu1 %v4083_v0  ;;  %v3723_v41 = vpack.c.bf16 %v1251_v38, %v1250_v37  ;;  %v1429_v38 = vld [vmem:[#allocation2 + $0x370] sm:$0xff] }
 0x206   : > { %3637 = vmatpush3.bf16.msra.mxu0 %v3636_v40  ;;  %3661 = vmatpush3.bf16.msra.mxu1 %v3636_v40  ;;  %v1168_v40 = vld [vmem:[%s4263_s22 + $0x8] sm:$0xff] }
 0x207   : > { %3638 = vmatprep.subr.bf16.mxu0 %v4083_v0  ;;  %3662 = vmatprep.subr.bf16.mxu1 %v4083_v0 }
 0x20a   : > { %3640 = vmatpush3.bf16.msra.mxu0 %v3639_v43  ;;  %3664 = vmatpush3.bf16.msra.mxu1 %v3639_v43  ;;  %v1253_v43 = vld [vmem:[#allocation2 + $0x2a8] sm:$0xff] }
 0x20b   : > { %3689 = vmatprep.subr.bf16.mxu1 %v4083_v0  ;;  %3665 = vmatprep.subr.bf16.mxu0 %v4083_v0  ;;  %v3726_v44 = vpack.c.bf16 %v1253_v43, %v1252_v42  ;;  %v1582_v42 = vld [vmem:[#allocation2 + $0x380] sm:$0xff]  ;;  %v1583_v43 = vld [vmem:[#allocation2 + $0x388] sm:$0xff] }
 0x2c0   : > { %v678_v51 = vpop.f32.mrb[4].mxu0  ;;  %v749_v52 = vpop.f32.mrb[4].mxu1 }
 0x2c1   : > { %v679_v55 = vadd.f32 %v2356_v50, %v678_v51  ;;  %v750_v56 = vadd.f32 %v2356_v50, %v749_v52  ;;  %v2887_v57 = vpop.f32.mrb[5].mxu0  ;;  %v2922_v58 = vpop.f32.mrb[5].mxu1  ;;  %v1257_v50 = vld [vmem:[#allocation2 + $0x2c8] sm:$0xff]  ;;  %v1258_v52 = vld [vmem:[#allocation2 + $0x2d0] sm:$0xff] }
 0x2c2   : > { %v3732_v51 = vpack.c.bf16 %v1257_v50, %v1256_v49  ;;  %v1262_v58 = vld [vmem:[#allocation2 + $0x2f0] sm:$0xff] }
 0x2c3   : > { %v682_v59 = vmax.f32 %v679_v55, 0.0  ;;  %v753_v60 = vmax.f32 %v750_v56, 0.0  ;;  %v3735_v55 = vpack.c.bf16 %v1259_v53, %v1258_v52  ;;  %v1261_v56 = vld [vmem:[#allocation2 + $0x2e8] sm:$0xff]  ;;  %v1584_v53 = vld [vmem:[#allocation2 + $0x390] sm:$0xff] }
 0x2c4   : > { %v3738_v57 = vpack.c.bf16 %v1261_v56, %v1260_v54  ;;  %v1585_v54 = vld [vmem:[#allocation2 + $0x398] sm:$0xff] }
 0x2c5   : > { %2956 = vmatmul.mubr.f32.vlgmr.msra.gmra.mrb[6].mxu0 %v682_v59  ;;  %2991 = vmatmul.mubr.f32.vlgmr.msra.gmra.mrb[6].mxu1 %v753_v60  ;;  %v1263_v59 = vld [vmem:[#allocation2 + $0x2f8] sm:$0xff]  ;;  %v3819_v56 = vpack.c.bf16 %v1585_v54, %v1584_v53 }
 0x2c6   : > { %3691 = vmatpush3.bf16.msk.msra.mxu1 %vm4255_vm4, %v4086_v3  ;;  %3032 = vmatprep.mubr.msk.f32.mxu1 %vm4084_vm0, %v4085_v1  ;;  %v3741_v60 = vpack.c.bf16 %v1263_v59, %v1262_v58  ;;  %v1587_v58 = vld [vmem:[#allocation2 + $0x3a8] sm:$0xff] }
 0x2c7   : > { %3692 = vmatprep.subr.bf16.mxu1 %v4083_v0  ;;  %3667 = vmatpush3.bf16.msra.mxu0 %v3666_v62 }
 0x2c8   : > { %3668 = vmatprep.subr.bf16.mxu0 %v4083_v0  ;;  %3025 = vmatprep.mubr.msk.f32.mxu0 %vm4084_vm0, %v4085_v1 }
 0x2c9   : > { %3033 = vmatmul.mubr.msk.f32.vlgmr.msra.gmra.mrb[8].mxu1 %vm1018_vm5, %v1017_v4 }
 0x2ca   : > { %3694 = vmatpush3.bf16.msra.mxu1 %v3666_v62  ;;  %3067 = vmatprep.mubr.msk.f32.mxu1 %vm4084_vm0, %v4085_v1 }
 0x2cb   : > { %3695 = vmatprep.subr.bf16.mxu1 %v4083_v0  ;;  %3670 = vmatpush3.bf16.msra.mxu0 %v3669_v5 }
 0x2cc   : > { %3671 = vmatprep.subr.bf16.mxu0 %v4083_v0 }
 0x2ce   : > { %3697 = vmatpush3.bf16.msra.mxu1 %v3669_v5 }
 0x2cf   : > { %3698 = vmatprep.subr.bf16.mxu1 %v4083_v0  ;;  %3673 = vmatpush3.bf16.msra.mxu0 %v3672_v8 }
 0x2d0   : > { %3674 = vmatprep.subr.bf16.mxu0 %v4083_v0 }
 0x2d2   : > { %3700 = vmatpush3.bf16.msra.mxu1 %v3672_v8 }
 0x2d3   : > { %3701 = vmatprep.subr.bf16.mxu1 %v4083_v0  ;;  %3676 = vmatpush3.bf16.msra.mxu0 %v3675_v11 }
 0x2d4   : > { %3677 = vmatprep.subr.bf16.mxu0 %v4083_v0 }
 0x2d6   : > { %3703 = vmatpush3.bf16.msra.mxu1 %v3675_v11 }
 0x2d7   : > { %3704 = vmatprep.subr.bf16.mxu1 %v4083_v0  ;;  %3679 = vmatpush3.bf16.msra.mxu0 %v3678_v14 }
 0x2d8   : > { %3680 = vmatprep.subr.bf16.mxu0 %v4083_v0 }
 0x2da   : > { %3706 = vmatpush3.bf16.msra.mxu1 %v3678_v14 }
 0x2db   : > { %3707 = vmatprep.subr.bf16.mxu1 %v4083_v0  ;;  %3682 = vmatpush3.bf16.msra.mxu0 %v3681_v17 }
 0x2dc   : > { %3683 = vmatprep.subr.bf16.mxu0 %v4083_v0 }
 0x2de   : > { %3709 = vmatpush3.bf16.msra.mxu1 %v3681_v17  ;;  %v3768_v17 = vpack.c.bf16 %v1416_v13, %v1415_v12  ;;  %v2370_v13 = vld [vmem:[%s4466_s3 + $0x6] ss:$0 sm:$0xff] }
 0x2df   : > { %3710 = vmatprep.subr.bf16.mxu1 %v4083_v0  ;;  %3685 = vmatpush3.bf16.msra.mxu0 %v3684_v20 }
 0x2e0   : > { %3686 = vmatprep.subr.bf16.mxu0 %v4083_v0 }
 0x2e2   : > { %3712 = vmatpush3.bf16.msra.mxu1 %v3684_v20  ;;  %v1418_v20 = vld [vmem:[#allocation2 + $0x318] sm:$0xff] }
 0x2e3   : > { %3713 = vmatprep.subr.bf16.mxu1 %v4083_v0  ;;  %3688 = vmatpush3.bf16.msra.mxu0 %v3687_v23 }
 0x2e4   : > { %3716 = vmatprep.subr.bf16.mxu0 %v4083_v0 }
 0x2e6   : > { %3715 = vmatpush3.bf16.msra.mxu1 %v3687_v23  ;;  %v3771_v23 = vpack.c.bf16 %v1418_v20, %v1417_v19 }
 0x2e7   : > { %3743 = vmatprep.subr.bf16.mxu1 %v4083_v0 }
 0x398   : > { %v845_v25 = vpop.f32.mrb[6].mxu0  ;;  %v916_v26 = vpop.f32.mrb[6].mxu1 }
 0x399   : > { %v846_v29 = vadd.f32 %v2358_v24, %v845_v25  ;;  %v917_v30 = vadd.f32 %v2358_v24, %v916_v26  ;;  %v2957_v31 = vpop.f32.mrb[7].mxu0  ;;  %v2992_v32 = vpop.f32.mrb[7].mxu1  ;;  %v1420_v24 = vld [vmem:[#allocation2 + $0x328] sm:$0xff]  ;;  %v1421_v26 = vld [vmem:[#allocation2 + $0x330] sm:$0xff] }
 0x39a   : > { %v3774_v25 = vpack.c.bf16 %v1420_v24, %v1419_v47  ;;  %v3777_v28 = vpack.c.bf16 %v1422_v27, %v1421_v26  ;;  %v1425_v32 = vld [vmem:[#allocation2 + $0x350] sm:$0xff]  ;;  %v1752_v24 = vld [vmem:[#allocation2 + $0x418] sm:$0xff]  ;;  %v1753_v27 = vld [vmem:[#allocation2 + $0x420] sm:$0xff] }
 0x39b   : > { %v849_v33 = vmax.f32 %v846_v29, 0.0  ;;  %v920_v34 = vmax.f32 %v917_v30, 0.0  ;;  %v1423_v29 = vld [vmem:[#allocation2 + $0x340] sm:$0xff]  ;;  %v1424_v30 = vld [vmem:[#allocation2 + $0x348] sm:$0xff]  ;;  %v1751_v47 = vld [vmem:[#allocation2 + $0x410] sm:$0xff] }
 0x39c   : > { %v4296_v36 = vpop.f32.mrb[8].mxu1  ;;  %v3780_v31 = vpack.c.bf16 %v1424_v30, %v1423_v29  ;;  %v3867_v26 = vpack.c.bf16 %v1752_v24, %v1751_v47  ;;  %v1755_v30 = vld [vmem:[#allocation2 + $0x430] sm:$0xff] }
 0x39d   : > { %3026 = vmatmul.mubr.f32.vlgmr.msra.gmra.mrb[8].mxu0 %v849_v33  ;;  %3068 = vmatmul.mubr.f32.vlgmr.msra.gmra.mrb[10].mxu1 %v920_v34  ;;  %v3034_v39 = vpop.f32.mrb[9].mxu1  ;;  %v1426_v33 = vld [vmem:[#allocation2 + $0x358] sm:$0xff] }
 0x39e   : > { %3718 = vmatpush3.bf16.msk.msra.mxu0 %vm4255_vm4, %v4086_v3  ;;  %3074 = vmatprep.mubr.msk.f32.mxu0 %vm4084_vm0, %v4085_v1  ;;  %v3783_v34 = vpack.c.bf16 %v1426_v33, %v1425_v32  ;;  %v1430_v39 = vld [vmem:[#allocation2 + $0x378] sm:$0xff]  ;;  %v1757_v33 = vld [vmem:[#allocation2 + $0x440] sm:$0xff] }
 0x39f   : > { %3719 = vmatprep.subr.bf16.mxu0 %v4083_v0  ;;  %3745 = vmatpush3.bf16.msra.mxu1 %v3720_v35 }
 0x3a0   : > { %3746 = vmatprep.subr.bf16.mxu1 %v4083_v0  ;;  %3144 = vmatprep.mubr.msk.f32.mxu1 %vm4084_vm0, %v4085_v1 }
 0x3a1   : > { %3075 = vmatmul.mubr.msk.f32.vlgmr.msra.gmra.mrb[10].mxu0 %vm1018_vm5, %v1168_v40  ;;  %v3789_v40 = vpack.c.bf16 %v1430_v39, %v1429_v38  ;;  %v1761_v39 = vld [vmem:[#allocation2 + $0x460] sm:$0xff] }
 0x3a2   : > { %3721 = vmatpush3.bf16.msra.mxu0 %v3720_v35  ;;  %3109 = vmatprep.mubr.msk.f32.mxu0 %vm4084_vm0, %v4085_v1  ;;  %v1427_v35 = vld [vmem:[#allocation2 + $0x360] sm:$0xff] }
 0x3a3   : > { %3722 = vmatprep.subr.bf16.mxu0 %v4083_v0  ;;  %3748 = vmatpush3.bf16.msra.mxu1 %v3723_v41 }
 0x3a4   : > { %3749 = vmatprep.subr.bf16.mxu1 %v4083_v0 }
 0x3a6   : > { %3724 = vmatpush3.bf16.msra.mxu0 %v3723_v41  ;;  %v2368_v41 = vld [vmem:[%s4466_s3 + $0x5] ss:$0 sm:$0xff] }
 0x3a7   : > { %3725 = vmatprep.subr.bf16.mxu0 %v4083_v0  ;;  %3751 = vmatpush3.bf16.msra.mxu1 %v3726_v44 }
 0x3a8   : > { %3752 = vmatprep.subr.bf16.mxu1 %v4083_v0 }
 0x3aa   : > { %3727 = vmatpush3.bf16.msra.mxu0 %v3726_v44 }
 0x3ab   : > { %3728 = vmatprep.subr.bf16.mxu0 %v4083_v0  ;;  %3754 = vmatpush3.bf16.msra.mxu1 %v3729_v48 }
 0x3ac   : > { %3755 = vmatprep.subr.bf16.mxu1 %v4083_v0 }
 0x3ae   : > { %3730 = vmatpush3.bf16.msra.mxu0 %v3729_v48 }
 0x3af   : > { %3731 = vmatprep.subr.bf16.mxu0 %v4083_v0  ;;  %3757 = vmatpush3.bf16.msra.mxu1 %v3732_v51 }
 0x3b0   : > { %3758 = vmatprep.subr.bf16.mxu1 %v4083_v0 }
 0x3b2   : > { %3733 = vmatpush3.bf16.msra.mxu0 %v3732_v51  ;;  %v3816_v51 = vpack.c.bf16 %v1583_v43, %v1582_v42  ;;  %v1763_v42 = vld [vmem:[#allocation2 + $0x470] sm:$0xff]  ;;  %v1764_v43 = vld [vmem:[#allocation2 + $0x478] sm:$0xff] }
 0x3b3   : > { %3734 = vmatprep.subr.bf16.mxu0 %v4083_v0  ;;  %3760 = vmatpush3.bf16.msra.mxu1 %v3735_v55 }
 0x3b4   : > { %3761 = vmatprep.subr.bf16.mxu1 %v4083_v0 }
 0x3b6   : > { %3736 = vmatpush3.bf16.msra.mxu0 %v3735_v55 }
 0x3b7   : > { %3737 = vmatprep.subr.bf16.mxu0 %v4083_v0  ;;  %3763 = vmatpush3.bf16.msra.mxu1 %v3738_v57 }
 0x3b8   : > { %3764 = vmatprep.subr.bf16.mxu1 %v4083_v0 }
 0x3ba   : > { %3739 = vmatpush3.bf16.msra.mxu0 %v3738_v57  ;;  %v1586_v57 = vld [vmem:[#allocation2 + $0x3a0] sm:$0xff] }
 0x3bb   : > { %3740 = vmatprep.subr.bf16.mxu0 %v4083_v0  ;;  %3766 = vmatpush3.bf16.msra.mxu1 %v3741_v60  ;;  %v3822_v59 = vpack.c.bf16 %v1587_v58, %v1586_v57  ;;  %v1918_v57 = vld [vmem:[#allocation2 + $0x490] sm:$0xff]  ;;  %v1919_v58 = vld [vmem:[#allocation2 + $0x498] sm:$0xff] }
 0x3bc   : > { %3791 = vmatprep.subr.bf16.mxu1 %v4083_v0 }
 0x3be   : > { %3742 = vmatpush3.bf16.msra.mxu0 %v3741_v60  ;;  %v1588_v60 = vld [vmem:[#allocation2 + $0x3b0] sm:$0xff] }
 0x3bf   : > { %3767 = vmatprep.subr.bf16.mxu0 %v4083_v0 }
 0x470   : > { %v1012_v62 = vpop.f32.mrb[8].mxu0  ;;  %v1163_v63 = vpop.f32.mrb[10].mxu1 }
 0x471   : > { %v1013_v2 = vadd.f32 %v2360_v61, %v1012_v62  ;;  %v1164_v3 = vadd.f32 %v2360_v61, %v1163_v63  ;;  %v3027_v4 = vpop.f32.mrb[9].mxu0  ;;  %v3069_v5 = vpop.f32.mrb[11].mxu1  ;;  %v1589_v61 = vld [vmem:[#allocation2 + $0x3b8] sm:$0xff]  ;;  %v1590_v63 = vld [vmem:[#allocation2 + $0x3c0] sm:$0xff] }
 0x472   : > { %v3825_v62 = vpack.c.bf16 %v1589_v61, %v1588_v60  ;;  %v1592_v4 = vld [vmem:[#allocation2 + $0x3d0] sm:$0xff]  ;;  %v1593_v5 = vld [vmem:[#allocation2 + $0x3d8] sm:$0xff]  ;;  %v3915_v60 = vpack.c.bf16 %v1919_v58, %v1918_v57  ;;  %v1920_v61 = vld [vmem:[#allocation2 + $0x4a0] sm:$0xff] }
 0x473   : > { %1016 = vst [vmem:[%s4333_s29] sm:$0xff] %v1013_v2  ;;  %v1092_v6 = vmul.f32 0.5, %v1013_v2  ;;  %v1242_v7 = vmul.f32 0.5, %v1164_v3  ;;  %1167 = vst [vmem:[%s4333_s29 + $0x8] sm:$0xff] %v1164_v3 }
 0x474   : > { %v1238_v8 = vpop.f32.mrb[10].mxu0 }
 0x475   : > { %v1093_v9 = vmul.f32 1.442695, %v1092_v6  ;;  %v1243_v10 = vmul.f32 1.442695, %v1242_v7  ;;  %v3076_v11 = vpop.f32.mrb[11].mxu0  ;;  %v3831_v6 = vpack.c.bf16 %v1593_v5, %v1592_v4  ;;  %v1594_v7 = vld [vmem:[#allocation2 + $0x3e0] sm:$0xff] }
 0x476   : > { %v1597_v11 = vld [vmem:[#allocation2 + $0x3f8] sm:$0xff]  ;;  %v1924_v5 = vld [vmem:[#allocation2 + $0x4c0] sm:$0xff] }
 0x477   : > { %4032 = vpow2.f32 %v1093_v9 }
 0x478   : > { %4034 = vpow2.f32 %v1243_v10  ;;  %v1596_v10 = vld [vmem:[#allocation2 + $0x3f0] sm:$0xff] }
 0x479   : > { %v3837_v12 = vpack.c.bf16 %v1597_v11, %v1596_v10  ;;  %v1928_v11 = vld [vmem:[#allocation2 + $0x4e0] sm:$0xff] }
 0x481   : > { %v4033_v14 = vpop.eup %4032 }
 0x482   : > { %v4035_v15 = vpop.eup %4034  ;;  %v1095_v16 = vmul.f32 %v4033_v14, %v4296_v36  ;;  %v1428_v36 = vld [vmem:[#allocation2 + $0x368] sm:$0xff]  ;;  %v1749_v14 = vld [vmem:[#allocation2 + $0x400] sm:$0xff] }
 0x483   : > { %v1245_v18 = vmul.f32 %v4035_v15, %v1238_v8  ;;  %v3786_v37 = vpack.c.bf16 %v1428_v36, %v1427_v35  ;;  %v1595_v8 = vld [vmem:[#allocation2 + $0x3e8] sm:$0xff]  ;;  %v1759_v36 = vld [vmem:[#allocation2 + $0x450] sm:$0xff] }
 0x484   : > { %v1096_v21 = vsel %vm242_vm8, %v1095_v16, %v1013_v2  ;;  %v1591_v2 = vld [vmem:[#allocation2 + $0x3c8] sm:$0xff]  ;;  %v3834_v9 = vpack.c.bf16 %v1595_v8, %v1594_v7  ;;  %v1926_v8 = vld [vmem:[#allocation2 + $0x4d0] sm:$0xff] }
 0x485   : > { %3110 = vmatmul.mubr.f32.vlgmr.msra.gmra.mrb[12].mxu0 %v1096_v21  ;;  %v1246_v22 = vsel %vm242_vm8, %v1245_v18, %v1164_v3  ;;  %v3828_v3 = vpack.c.bf16 %v1591_v2, %v1590_v63  ;;  %v1750_v15 = vld [vmem:[#allocation2 + $0x408] sm:$0xff]  ;;  %v1922_v2 = vld [vmem:[#allocation2 + $0x4b0] sm:$0xff] }
 0x486   : > { %3145 = vmatmul.mubr.f32.vlgmr.msra.gmra.mrb[12].mxu1 %v1246_v22  ;;  %3769 = vmatpush3.bf16.msra.mxu0 %v3768_v17  ;;  %v3864_v22 = vpack.c.bf16 %v1750_v15, %v1749_v14  ;;  %v1930_v14 = vld [vmem:[#allocation2 + $0x4f0] sm:$0xff]  ;;  %v1931_v15 = vld [vmem:[#allocation2 + $0x4f8] sm:$0xff] }
 0x487   : > { %3793 = vmatpush3.bf16.msra.mxu1 %v3768_v17  ;;  %3770 = vmatprep.subr.bf16.mxu0 %v4083_v0 }
 0x488   : > { %3794 = vmatprep.subr.bf16.mxu1 %v4083_v0  ;;  %3179 = vmatprep.mubr.msk.f32.mxu0 %vm4084_vm0, %v4085_v1 }
 0x489   : > { %3214 = vmatprep.mubr.msk.f32.mxu1 %vm4084_vm0, %v4085_v1 }
 0x48a   : > { %3772 = vmatpush3.bf16.msra.mxu0 %v3771_v23 }
 0x48b   : > { %3796 = vmatpush3.bf16.msra.mxu1 %v3771_v23  ;;  %3773 = vmatprep.subr.bf16.mxu0 %v4083_v0 }
 0x48c   : > { %3797 = vmatprep.subr.bf16.mxu1 %v4083_v0 }
 0x48e   : > { %3775 = vmatpush3.bf16.msra.mxu0 %v3774_v25 }
 0x48f   : > { %3799 = vmatpush3.bf16.msra.mxu1 %v3774_v25  ;;  %3776 = vmatprep.subr.bf16.mxu0 %v4083_v0 }
 0x490   : > { %3800 = vmatprep.subr.bf16.mxu1 %v4083_v0 }
 0x492   : > { %3778 = vmatpush3.bf16.msra.mxu0 %v3777_v28 }
 0x493   : > { %3802 = vmatpush3.bf16.msra.mxu1 %v3777_v28  ;;  %3779 = vmatprep.subr.bf16.mxu0 %v4083_v0  ;;  %v1754_v28 = vld [vmem:[#allocation2 + $0x428] sm:$0xff] }
 0x494   : > { %3803 = vmatprep.subr.bf16.mxu1 %v4083_v0  ;;  %v3870_v29 = vpack.c.bf16 %v1754_v28, %v1753_v27  ;;  %v2085_v27 = vld [vmem:[#allocation2 + $0x510] sm:$0xff]  ;;  %v2086_v28 = vld [vmem:[#allocation2 + $0x518] sm:$0xff] }
 0x496   : > { %3781 = vmatpush3.bf16.msra.mxu0 %v3780_v31 }
 0x497   : > { %3805 = vmatpush3.bf16.msra.mxu1 %v3780_v31  ;;  %3782 = vmatprep.subr.bf16.mxu0 %v4083_v0  ;;  %v1756_v31 = vld [vmem:[#allocation2 + $0x438] sm:$0xff] }
 0x498   : > { %3806 = vmatprep.subr.bf16.mxu1 %v4083_v0  ;;  %v3873_v32 = vpack.c.bf16 %v1756_v31, %v1755_v30  ;;  %v3963_v30 = vpack.c.bf16 %v2086_v28, %v2085_v27  ;;  %v2087_v31 = vld [vmem:[#allocation2 + $0x520] sm:$0xff] }
 0x49a   : > { %3784 = vmatpush3.bf16.msra.mxu0 %v3783_v34 }
 0x49b   : > { %3808 = vmatpush3.bf16.msra.mxu1 %v3783_v34  ;;  %3785 = vmatprep.subr.bf16.mxu0 %v4083_v0  ;;  %v1758_v34 = vld [vmem:[#allocation2 + $0x448] sm:$0xff] }
 0x49c   : > { %3809 = vmatprep.subr.bf16.mxu1 %v4083_v0  ;;  %v3876_v35 = vpack.c.bf16 %v1758_v34, %v1757_v33  ;;  %v2089_v34 = vld [vmem:[#allocation2 + $0x530] sm:$0xff] }
 0x49e   : > { %3787 = vmatpush3.bf16.msra.mxu0 %v3786_v37 }
 0x49f   : > { %3811 = vmatpush3.bf16.msra.mxu1 %v3786_v37  ;;  %3788 = vmatprep.subr.bf16.mxu0 %v4083_v0  ;;  %v1760_v37 = vld [vmem:[#allocation2 + $0x458] sm:$0xff] }
 0x4a0   : > { %3812 = vmatprep.subr.bf16.mxu1 %v4083_v0  ;;  %v3879_v38 = vpack.c.bf16 %v1760_v37, %v1759_v36  ;;  %v2091_v37 = vld [vmem:[#allocation2 + $0x540] sm:$0xff] }
 0x4a2   : > { %3790 = vmatpush3.bf16.msra.mxu0 %v3789_v40 }
 0x4a3   : > { %3814 = vmatpush3.bf16.msra.mxu1 %v3789_v40  ;;  %3815 = vmatprep.subr.bf16.mxu0 %v4083_v0  ;;  %v1762_v40 = vld [vmem:[#allocation2 + $0x468] sm:$0xff] }
 0x4a4   : > { %3839 = vmatprep.subr.bf16.mxu1 %v4083_v0 }
 0x558   : > { %v1338_v44 = vpop.f32.mrb[12].mxu0 }
 0x559   : > { %v1339_v45 = vadd.f32 %v2368_v41, %v1338_v44  ;;  %v1409_v46 = vpop.f32.mrb[12].mxu1  ;;  %v3111_v48 = vpop.f32.mrb[13].mxu0  ;;  %v3885_v44 = vpack.c.bf16 %v1764_v43, %v1763_v42  ;;  %v2095_v42 = vld [vmem:[#allocation2 + $0x560] sm:$0xff]  ;;  %v2096_v43 = vld [vmem:[#allocation2 + $0x568] sm:$0xff] }
 0x55a   : > { %v1410_v49 = vadd.f32 %v2368_v41, %v1409_v46  ;;  %v3146_v50 = vpop.f32.mrb[13].mxu1  ;;  %v3882_v41 = vpack.c.bf16 %v1762_v40, %v1761_v39  ;;  %v1916_v46 = vld [vmem:[#allocation2 + $0x480] sm:$0xff]  ;;  %v1917_v48 = vld [vmem:[#allocation2 + $0x488] sm:$0xff]  ;;  %v2093_v39 = vld [vmem:[#allocation2 + $0x550] sm:$0xff] }
 0x55b   : > { %v1342_v52 = vmax.f32 %v1339_v45, 0.0  ;;  %v2372_v45 = vld [vmem:[%s4466_s3 + $0x7] ss:$0 sm:$0xff]  ;;  %v2094_v40 = vld [vmem:[#allocation2 + $0x558] sm:$0xff] }
 0x55c   : > { %v1413_v55 = vmax.f32 %v1410_v49, 0.0 }
 0x55d   : > { %3180 = vmatmul.mubr.f32.vlgmr.msra.gmra.mrb[14].mxu0 %v1342_v52 }
 0x55e   : > { %3215 = vmatmul.mubr.f32.vlgmr.msra.gmra.mrb[14].mxu1 %v1413_v55  ;;  %3817 = vmatpush3.bf16.msra.mxu0 %v3816_v51  ;;  %v3912_v55 = vpack.c.bf16 %v1917_v48, %v1916_v46  ;;  %v2098_v46 = vld [vmem:[#allocation2 + $0x578] sm:$0xff] }
 0x55f   : > { %3841 = vmatpush3.bf16.msra.mxu1 %v3816_v51  ;;  %3818 = vmatprep.subr.bf16.mxu0 %v4083_v0 }
 0x560   : > { %3842 = vmatprep.subr.bf16.mxu1 %v4083_v0  ;;  %3249 = vmatprep.mubr.msk.f32.mxu0 %vm4084_vm0, %v4085_v1 }
 0x561   : > { %3284 = vmatprep.mubr.msk.f32.mxu1 %vm4084_vm0, %v4085_v1 }
 0x562   : > { %3820 = vmatpush3.bf16.msra.mxu0 %v3819_v56 }
 0x563   : > { %3844 = vmatpush3.bf16.msra.mxu1 %v3819_v56  ;;  %3821 = vmatprep.subr.bf16.mxu0 %v4083_v0 }
 0x564   : > { %3845 = vmatprep.subr.bf16.mxu1 %v4083_v0 }
 0x566   : > { %3823 = vmatpush3.bf16.msra.mxu0 %v3822_v59 }
 0x567   : > { %3847 = vmatpush3.bf16.msra.mxu1 %v3822_v59  ;;  %3824 = vmatprep.subr.bf16.mxu0 %v4083_v0 }
 0x568   : > { %3848 = vmatprep.subr.bf16.mxu1 %v4083_v0 }
 0x56a   : > { %3826 = vmatpush3.bf16.msra.mxu0 %v3825_v62 }
 0x56b   : > { %3850 = vmatpush3.bf16.msra.mxu1 %v3825_v62  ;;  %3827 = vmatprep.subr.bf16.mxu0 %v4083_v0  ;;  %v1921_v62 = vld [vmem:[#allocation2 + $0x4a8] sm:$0xff] }
 0x56c   : > { %3851 = vmatprep.subr.bf16.mxu1 %v4083_v0  ;;  %v3918_v63 = vpack.c.bf16 %v1921_v62, %v1920_v61 }
 0x56e   : > { %3829 = vmatpush3.bf16.msra.mxu0 %v3828_v3 }
 0x56f   : > { %3853 = vmatpush3.bf16.msra.mxu1 %v3828_v3  ;;  %3830 = vmatprep.subr.bf16.mxu0 %v4083_v0  ;;  %v1923_v3 = vld [vmem:[#allocation2 + $0x4b8] sm:$0xff] }
 0x570   : > { %3854 = vmatprep.subr.bf16.mxu1 %v4083_v0  ;;  %v3921_v4 = vpack.c.bf16 %v1923_v3, %v1922_v2  ;;  %v2178_v3 = vld [vmem:[%s4333_s29] sm:$0xff] }
 0x572   : > { %3832 = vmatpush3.bf16.msra.mxu0 %v3831_v6 }
 0x573   : > { %3856 = vmatpush3.bf16.msra.mxu1 %v3831_v6  ;;  %3833 = vmatprep.subr.bf16.mxu0 %v4083_v0  ;;  %v1925_v6 = vld [vmem:[#allocation2 + $0x4c8] sm:$0xff] }
 0x574   : > { %3857 = vmatprep.subr.bf16.mxu1 %v4083_v0  ;;  %v3924_v7 = vpack.c.bf16 %v1925_v6, %v1924_v5  ;;  %v2252_v6 = vld [vmem:[%s4333_s29 + $0x8] sm:$0xff] }
 0x576   : > { %3835 = vmatpush3.bf16.msra.mxu0 %v3834_v9 }
 0x577   : > { %3859 = vmatpush3.bf16.msra.mxu1 %v3834_v9  ;;  %3836 = vmatprep.subr.bf16.mxu0 %v4083_v0  ;;  %v1927_v9 = vld [vmem:[#allocation2 + $0x4d8] sm:$0xff] }
 0x578   : > { %3860 = vmatprep.subr.bf16.mxu1 %v4083_v0  ;;  %v3927_v10 = vpack.c.bf16 %v1927_v9, %v1926_v8 }
 0x57a   : > { %3838 = vmatpush3.bf16.msra.mxu0 %v3837_v12 }
 0x57b   : > { %3862 = vmatpush3.bf16.msra.mxu1 %v3837_v12  ;;  %3863 = vmatprep.subr.bf16.mxu0 %v4083_v0  ;;  %v1929_v12 = vld [vmem:[#allocation2 + $0x4e8] sm:$0xff] }
 0x57c   : > { %3887 = vmatprep.subr.bf16.mxu1 %v4083_v0 }
 0x630   : > { %v1505_v16 = vpop.f32.mrb[14].mxu0 }
 0x631   : > { %v1506_v17 = vadd.f32 %v2370_v13, %v1505_v16  ;;  %v1576_v18 = vpop.f32.mrb[14].mxu1  ;;  %v3181_v19 = vpop.f32.mrb[15].mxu0  ;;  %v3933_v16 = vpack.c.bf16 %v1931_v15, %v1930_v14 }
 0x632   : > { %v1577_v20 = vadd.f32 %v2370_v13, %v1576_v18  ;;  %v3216_v21 = vpop.f32.mrb[15].mxu1  ;;  %v3930_v13 = vpack.c.bf16 %v1929_v12, %v1928_v11  ;;  %v2083_v18 = vld [vmem:[#allocation2 + $0x500] sm:$0xff]  ;;  %v2084_v19 = vld [vmem:[#allocation2 + $0x508] sm:$0xff] }
 0x633   : > { %v1509_v23 = vmax.f32 %v1506_v17, 0.0  ;;  %v2374_v17 = vld [vmem:[%s4466_s3 + $0x8] ss:$0 sm:$0xff] }
 0x634   : > { %v1580_v25 = vmax.f32 %v1577_v20, 0.0 }
 0x635   : > { %3250 = vmatmul.mubr.f32.vlgmr.msra.gmra.mrb[16].mxu0 %v1509_v23 }
 0x636   : > { %3285 = vmatmul.mubr.f32.vlgmr.msra.gmra.mrb[16].mxu1 %v1580_v25  ;;  %3865 = vmatpush3.bf16.msra.mxu0 %v3864_v22  ;;  %v3960_v25 = vpack.c.bf16 %v2084_v19, %v2083_v18 }
 0x637   : > { %3889 = vmatpush3.bf16.msra.mxu1 %v3864_v22  ;;  %3866 = vmatprep.subr.bf16.mxu0 %v4083_v0 }
 0x638   : > { %3890 = vmatprep.subr.bf16.mxu1 %v4083_v0  ;;  %3319 = vmatprep.mubr.msk.f32.mxu0 %vm4084_vm0, %v4085_v1 }
 0x639   : > { %3354 = vmatprep.mubr.msk.f32.mxu1 %vm4084_vm0, %v4085_v1 }
 0x63a   : > { %3868 = vmatpush3.bf16.msra.mxu0 %v3867_v26 }
 0x63b   : > { %3892 = vmatpush3.bf16.msra.mxu1 %v3867_v26  ;;  %3869 = vmatprep.subr.bf16.mxu0 %v4083_v0 }
 0x63c   : > { %3893 = vmatprep.subr.bf16.mxu1 %v4083_v0 }
 0x63e   : > { %3871 = vmatpush3.bf16.msra.mxu0 %v3870_v29 }
 0x63f   : > { %3895 = vmatpush3.bf16.msra.mxu1 %v3870_v29  ;;  %3872 = vmatprep.subr.bf16.mxu0 %v4083_v0 }
 0x640   : > { %3896 = vmatprep.subr.bf16.mxu1 %v4083_v0 }
 0x642   : > { %3874 = vmatpush3.bf16.msra.mxu0 %v3873_v32 }
 0x643   : > { %3898 = vmatpush3.bf16.msra.mxu1 %v3873_v32  ;;  %3875 = vmatprep.subr.bf16.mxu0 %v4083_v0  ;;  %v2088_v32 = vld [vmem:[#allocation2 + $0x528] sm:$0xff] }
 0x644   : > { %3899 = vmatprep.subr.bf16.mxu1 %v4083_v0  ;;  %v3966_v33 = vpack.c.bf16 %v2088_v32, %v2087_v31 }
 0x646   : > { %3877 = vmatpush3.bf16.msra.mxu0 %v3876_v35 }
 0x647   : > { %3901 = vmatpush3.bf16.msra.mxu1 %v3876_v35  ;;  %3878 = vmatprep.subr.bf16.mxu0 %v4083_v0  ;;  %v2090_v35 = vld [vmem:[#allocation2 + $0x538] sm:$0xff] }
 0x648   : > { %3902 = vmatprep.subr.bf16.mxu1 %v4083_v0  ;;  %v3969_v36 = vpack.c.bf16 %v2090_v35, %v2089_v34 }
 0x64a   : > { %3880 = vmatpush3.bf16.msra.mxu0 %v3879_v38 }
 0x64b   : > { %3904 = vmatpush3.bf16.msra.mxu1 %v3879_v38  ;;  %3881 = vmatprep.subr.bf16.mxu0 %v4083_v0  ;;  %v2092_v38 = vld [vmem:[#allocation2 + $0x548] sm:$0xff] }
 0x64c   : > { %3905 = vmatprep.subr.bf16.mxu1 %v4083_v0 }
 0x64e   : > { %3883 = vmatpush3.bf16.msra.mxu0 %v3882_v41 }
 0x64f   : > { %3907 = vmatpush3.bf16.msra.mxu1 %v3882_v41  ;;  %3884 = vmatprep.subr.bf16.mxu0 %v4083_v0  ;;  %v3975_v41 = vpack.c.bf16 %v2094_v40, %v2093_v39 }
 0x650   : > { %3908 = vmatprep.subr.bf16.mxu1 %v4083_v0 }
 0x652   : > { %3886 = vmatpush3.bf16.msra.mxu0 %v3885_v44 }
 0x653   : > { %3910 = vmatpush3.bf16.msra.mxu1 %v3885_v44  ;;  %3911 = vmatprep.subr.bf16.mxu0 %v4083_v0  ;;  %v3978_v44 = vpack.c.bf16 %v2096_v43, %v2095_v42 }
 0x654   : > { %3935 = vmatprep.subr.bf16.mxu1 %v4083_v0 }
 0x708   : > { %v1672_v49 = vpop.f32.mrb[16].mxu0 }
 0x709   : > { %v1673_v50 = vadd.f32 %v2372_v45, %v1672_v49  ;;  %v1743_v51 = vpop.f32.mrb[16].mxu1  ;;  %v3251_v52 = vpop.f32.mrb[17].mxu0  ;;  %v2376_v49 = vld [vmem:[%s4466_s3 + $0x9] ss:$0 sm:$0xff] }
 0x70a   : > { %v1744_v53 = vadd.f32 %v2372_v45, %v1743_v51  ;;  %v3286_v54 = vpop.f32.mrb[17].mxu1  ;;  %v2097_v45 = vld [vmem:[#allocation2 + $0x570] sm:$0xff] }
 0x70b   : > { %v1676_v56 = vmax.f32 %v1673_v50, 0.0  ;;  %v3981_v48 = vpack.c.bf16 %v2098_v46, %v2097_v45 }
 0x70c   : > { %v1747_v59 = vmax.f32 %v1744_v53, 0.0 }
 0x70d   : > { %3320 = vmatmul.mubr.f32.vlgmr.msra.gmra.mrb[18].mxu0 %v1676_v56 }
 0x70e   : > { %3355 = vmatmul.mubr.f32.vlgmr.msra.gmra.mrb[18].mxu1 %v1747_v59  ;;  %3913 = vmatpush3.bf16.msra.mxu0 %v3912_v55 }
 0x70f   : > { %3937 = vmatpush3.bf16.msra.mxu1 %v3912_v55  ;;  %3914 = vmatprep.subr.bf16.mxu0 %v4083_v0 }
 0x710   : > { %3938 = vmatprep.subr.bf16.mxu1 %v4083_v0  ;;  %3389 = vmatprep.mubr.msk.f32.mxu0 %vm4084_vm0, %v4085_v1 }
 0x711   : > { %3424 = vmatprep.mubr.msk.f32.mxu1 %vm4084_vm0, %v4085_v1 }
 0x712   : > { %3916 = vmatpush3.bf16.msra.mxu0 %v3915_v60 }
 0x713   : > { %3940 = vmatpush3.bf16.msra.mxu1 %v3915_v60  ;;  %3917 = vmatprep.subr.bf16.mxu0 %v4083_v0 }
 0x714   : > { %3941 = vmatprep.subr.bf16.mxu1 %v4083_v0 }
 0x716   : > { %3919 = vmatpush3.bf16.msra.mxu0 %v3918_v63 }
 0x717   : > { %3943 = vmatpush3.bf16.msra.mxu1 %v3918_v63  ;;  %3920 = vmatprep.subr.bf16.mxu0 %v4083_v0 }
 0x718   : > { %3944 = vmatprep.subr.bf16.mxu1 %v4083_v0 }
 0x71a   : > { %3922 = vmatpush3.bf16.msra.mxu0 %v3921_v4 }
 0x71b   : > { %3946 = vmatpush3.bf16.msra.mxu1 %v3921_v4  ;;  %3923 = vmatprep.subr.bf16.mxu0 %v4083_v0 }
 0x71c   : > { %3947 = vmatprep.subr.bf16.mxu1 %v4083_v0 }
 0x71e   : > { %3925 = vmatpush3.bf16.msra.mxu0 %v3924_v7 }
 0x71f   : > { %3949 = vmatpush3.bf16.msra.mxu1 %v3924_v7  ;;  %3926 = vmatprep.subr.bf16.mxu0 %v4083_v0 }
 0x720   : > { %3950 = vmatprep.subr.bf16.mxu1 %v4083_v0 }
 0x722   : > { %3928 = vmatpush3.bf16.msra.mxu0 %v3927_v10 }
 0x723   : > { %3952 = vmatpush3.bf16.msra.mxu1 %v3927_v10  ;;  %3929 = vmatprep.subr.bf16.mxu0 %v4083_v0 }
 0x724   : > { %3953 = vmatprep.subr.bf16.mxu1 %v4083_v0 }
 0x726   : > { %3931 = vmatpush3.bf16.msra.mxu0 %v3930_v13 }
 0x727   : > { %3955 = vmatpush3.bf16.msra.mxu1 %v3930_v13  ;;  %3932 = vmatprep.subr.bf16.mxu0 %v4083_v0 }
 0x728   : > { %3956 = vmatprep.subr.bf16.mxu1 %v4083_v0 }
 0x72a   : > { %3934 = vmatpush3.bf16.msra.mxu0 %v3933_v16 }
 0x72b   : > { %3958 = vmatpush3.bf16.msra.mxu1 %v3933_v16  ;;  %3959 = vmatprep.subr.bf16.mxu0 %v4083_v0 }
 0x72c   : > { %3983 = vmatprep.subr.bf16.mxu1 %v4083_v0 }
 0x7e0   : > { %v1839_v20 = vpop.f32.mrb[18].mxu0 }
 0x7e1   : > { %v1840_v21 = vadd.f32 %v2374_v17, %v1839_v20  ;;  %v1910_v22 = vpop.f32.mrb[18].mxu1  ;;  %v3321_v23 = vpop.f32.mrb[19].mxu0 }
 0x7e2   : > { %v1911_v47 = vadd.f32 %v2374_v17, %v1910_v22  ;;  %v3356_v24 = vpop.f32.mrb[19].mxu1 }
 0x7e3   : > { %v1843_v26 = vmax.f32 %v1840_v21, 0.0 }
 0x7e4   : > { %v1914_v29 = vmax.f32 %v1911_v47, 0.0 }
 0x7e5   : > { %3390 = vmatmul.mubr.f32.vlgmr.msra.gmra.mrb[20].mxu0 %v1843_v26 }
 0x7e6   : > { %3425 = vmatmul.mubr.f32.vlgmr.msra.gmra.mrb[20].mxu1 %v1914_v29  ;;  %3961 = vmatpush3.bf16.msra.mxu0 %v3960_v25 }
 0x7e7   : > { %3985 = vmatpush3.bf16.msra.mxu1 %v3960_v25  ;;  %3962 = vmatprep.subr.bf16.mxu0 %v4083_v0 }
 0x7e8   : > { %3986 = vmatprep.subr.bf16.mxu1 %v4083_v0  ;;  %3459 = vmatprep.mubr.msk.f32.mxu0 %vm4084_vm0, %v4085_v1 }
 0x7e9   : > { %3494 = vmatprep.mubr.msk.f32.mxu1 %vm4084_vm0, %v4085_v1  ;;  %v3972_v1 = vpack.c.bf16 %v2092_v38, %v2091_v37 }
 0x7ea   : > { %3964 = vmatpush3.bf16.msra.mxu0 %v3963_v30 }
 0x7eb   : > { %3988 = vmatpush3.bf16.msra.mxu1 %v3963_v30  ;;  %3965 = vmatprep.subr.bf16.mxu0 %v4083_v0 }
 0x7ec   : > { %3989 = vmatprep.subr.bf16.mxu1 %v4083_v0 }
 0x7ee   : > { %3967 = vmatpush3.bf16.msra.mxu0 %v3966_v33 }
 0x7ef   : > { %3991 = vmatpush3.bf16.msra.mxu1 %v3966_v33  ;;  %3968 = vmatprep.subr.bf16.mxu0 %v4083_v0 }
 0x7f0   : > { %3992 = vmatprep.subr.bf16.mxu1 %v4083_v0 }
 0x7f2   : > { %3970 = vmatpush3.bf16.msra.mxu0 %v3969_v36 }
 0x7f3   : > { %3994 = vmatpush3.bf16.msra.mxu1 %v3969_v36  ;;  %3971 = vmatprep.subr.bf16.mxu0 %v4083_v0 }
 0x7f4   : > { %3995 = vmatprep.subr.bf16.mxu1 %v4083_v0 }
 0x7f6   : > { %3973 = vmatpush3.bf16.msra.mxu0 %v3972_v1 }
 0x7f7   : > { %3997 = vmatpush3.bf16.msra.mxu1 %v3972_v1  ;;  %3974 = vmatprep.subr.bf16.mxu0 %v4083_v0 }
 0x7f8   : > { %3998 = vmatprep.subr.bf16.mxu1 %v4083_v0 }
 0x7fa   : > { %3976 = vmatpush3.bf16.msra.mxu0 %v3975_v41 }
 0x7fb   : > { %4000 = vmatpush3.bf16.msra.mxu1 %v3975_v41  ;;  %3977 = vmatprep.subr.bf16.mxu0 %v4083_v0 }
 0x7fc   : > { %4001 = vmatprep.subr.bf16.mxu1 %v4083_v0 }
 0x7fe   : > { %3979 = vmatpush3.bf16.msra.mxu0 %v3978_v44 }
 0x7ff   : > { %4003 = vmatpush3.bf16.msra.mxu1 %v3978_v44  ;;  %3980 = vmatprep.subr.bf16.mxu0 %v4083_v0 }
 0x800   : > { %4004 = vmatprep.subr.bf16.mxu1 %v4083_v0  ;;  %v2378_v0 = vld [vmem:[%s4466_s3 + $0xa] ss:$0 sm:$0xff] }
 0x802   : > { %3982 = vmatpush3.bf16.msra.mxu0 %v3981_v48 }
 0x803   : > { %4006 = vmatpush3.bf16.msra.mxu1 %v3981_v48 }
 0x8b8   : > { %v2006_v50 = vpop.f32.mrb[20].mxu0 }
 0x8b9   : > { %v2007_v51 = vadd.f32 %v2376_v49, %v2006_v50  ;;  %v2077_v52 = vpop.f32.mrb[20].mxu1  ;;  %v3391_v53 = vpop.f32.mrb[21].mxu0 }
 0x8ba   : > { %v2078_v54 = vadd.f32 %v2376_v49, %v2077_v52  ;;  %v3426_v55 = vpop.f32.mrb[21].mxu1 }
 0x8bb   : > { %v2010_v56 = vmax.f32 %v2007_v51, 0.0 }
 0x8bc   : > { %v2081_v57 = vmax.f32 %v2078_v54, 0.0 }
 0x8bd   : > { %3460 = vmatmul.mubr.f32.vlgmr.msra.gmra.mrb[22].mxu0 %v2010_v56 }
 0x8be   : > { %3495 = vmatmul.mubr.f32.vlgmr.msra.gmra.mrb[22].mxu1 %v2081_v57 }
 0x990   : > { %v2173_v58 = vpop.f32.mrb[22].mxu0 }
 0x991   : > { %v2174_v59 = vadd.f32 %v2378_v0, %v2173_v58  ;;  %v2247_v60 = vpop.f32.mrb[22].mxu1  ;;  %v3461_v61 = vpop.f32.mrb[23].mxu0 }
 0x992   : > { %v3496_v62 = vpop.f32.mrb[23].mxu1  ;;  %v2248_v63 = vadd.f32 %v2378_v0, %v2247_v60 }
 0x993   : > { %4036 = vtanh.f32 %v2174_v59 }
 0x994   : > { %4038 = vtanh.f32 %v2248_v63 }
 0x99d   : > { %v4037_v2 = vpop.eup %4036 }
 0x99e   : > { %v2179_v4 = vadd.f32 %v4037_v2, %v2178_v3  ;;  %v4039_v5 = vpop.eup %4038 }
 0x99f   : > { %v2253_v7 = vadd.f32 %v4039_v5, %v2252_v6 }
 0x9a0   : > { %2180 = vst [vmem:[%s4333_s29] sm:$0xff] %v2179_v4 }
 0x9a1   : > { %2254 = vst [vmem:[%s4333_s29 + $0x8] sm:$0xff] %v2253_v7 }
 0x9a2 PF: > { %s15_s15 = sadd.s32 1, %s4078_s15  }
 0x9a3   : > { %p12_p3 = scmp.ge.s32.totalorder %s15_s15, 4  }
 0x9a5   :  { %14 = sbr.rel (!%p12_p3) target bundleno = 1 (0x1), region = 94 }
 0x9ac   :  { %2277 = vsyncpa [#allocation3], 1 }
 0x9ad   :  { %2279 = vsyncpa [#allocation3 + $0x1], 1 }

</bundles_post_ra>
